<compile_context>
chip_gen: v5e
topology: v5e:2x2
jax: 0.10.0
libtpu: 0.0.40
codegen_flags: <defaults>
</compile_context>

<pallas_src>
import functools

import jax
import jax.numpy as jnp
from jax import lax
from jax.experimental import pallas as pl
from jax.experimental.pallas import tpu as pltpu


def _round_up(x, m):
    return (x + m - 1) // m * m


def _ref_mlp_kernel(x_ref, v_ref, w1_ref, b1_ref, w2_ref, b2_ref, out_ref):
    x = x_ref[...].astype(jnp.float32)          # [TN, in_dim]
    v = v_ref[...].astype(jnp.float32)          # [TN, 3]

    # Linear -> ReLU
    h = jnp.dot(x, w1_ref[...], preferred_element_type=jnp.float32)
    h = h + b1_ref[...]                         # bias broadcast over rows
    h = jnp.maximum(h, 0.0)

    # Linear -> Tanh
    p = jnp.dot(h, w2_ref[...], preferred_element_type=jnp.float32)
    p = p + b2_ref[...]
    p = jnp.tanh(p)                             # [TN, 3]

    # norm_pred = p / ||p||  (dim=1 == last dim, p is [N, 3])
    p = p * lax.rsqrt(jnp.sum(p * p, axis=-1, keepdims=True))

    # ref_vec = 2 * <p, v> * p - v ; then normalize
    r = 2.0 * jnp.sum(p * v, axis=-1, keepdims=True) * p - v
    r = r * lax.rsqrt(jnp.sum(r * r, axis=-1, keepdims=True))

    # Single lane-padded output slab: [ref_vec(3) | norm_pred(3) | pad(2)]
    tn = r.shape[0]
    pad = jnp.zeros((tn, 2), jnp.float32)
    out_ref[...] = jnp.concatenate([r, p, pad], axis=-1).astype(out_ref.dtype)


@functools.partial(jax.jit, static_argnames=("tile_n",))
def _ref_mlp_pallas(brdf, viewdirs, w1, b1, w2, b2, *, tile_n):
    Np, in_dim = brdf.shape
    hid = w1.shape[1]
    grid = (Np // tile_n,)

    # Scoped-VMEM budget: double-buffered, lane-padded input/output tiles +
    # resident weights + intermediates margin.  Clamped into a range that is
    # above v5e's 16 MiB scoped default and comfortably under v7x's 64 MiB
    # physical VMEM.
    lane = 128
    per_buf = (tile_n * _round_up(in_dim, lane)      # brdf tile
               + tile_n * lane                        # viewdirs tile (padded)
               + tile_n * lane) * 4                   # output tile (padded)
    weights = (_round_up(in_dim, 8) * _round_up(hid, lane)
               + _round_up(hid, 8) * lane + 2 * lane) * 4
    vmem_bytes = 2 * per_buf + 2 * weights + (12 << 20)   # margin for temps
    vmem_bytes = int(min(max(vmem_bytes, 16 << 20), 48 << 20))

    out_shape = jax.ShapeDtypeStruct((Np, 8), jnp.float32)

    return pl.pallas_call(
        _ref_mlp_kernel,
        out_shape=out_shape,
        grid_spec=pltpu.PrefetchScalarGridSpec(
            num_scalar_prefetch=0,
            grid=grid,
            in_specs=[
                pl.BlockSpec((tile_n, in_dim), lambda i: (i, 0)),  # brdf tile
                pl.BlockSpec((tile_n, 3), lambda i: (i, 0)),       # viewdirs
                pl.BlockSpec((in_dim, hid), lambda i: (0, 0)),     # W1 (resident)
                pl.BlockSpec((1, hid), lambda i: (0, 0)),          # b1
                pl.BlockSpec((hid, 3), lambda i: (0, 0)),          # W2 (resident)
                pl.BlockSpec((1, 3), lambda i: (0, 0)),            # b2
            ],
            out_specs=pl.BlockSpec((tile_n, 8), lambda i: (i, 0)),
        ),
        compiler_params=pltpu.CompilerParams(
            dimension_semantics=("parallel",),
            vmem_limit_bytes=vmem_bytes),
    )(brdf, viewdirs, w1, b1, w2, b2)


def _pick_tile(n, tile_n):
    """Biggest tile <= tile_n (multiple of 8) with bounded padding waste."""
    tn = min(int(tile_n), _round_up(n, 8))
    tn = max(_round_up(tn, 8), 8)
    while tn > 8:
        padded = _round_up(n, tn)
        if padded - n <= max(n // 8, 8):
            break
        tn = max(_round_up(tn // 2, 8), 8)
    return tn


def ref_mlp_forward(brdf, viewdirs, w1, b1, w2, b2, *, tile_n=4096):
    """brdf: [N, in_dim], viewdirs: [N, 3]. Returns (ref_vec, norm_pred)."""
    N = brdf.shape[0]
    tn = _pick_tile(N, tile_n)
    Np = _round_up(N, tn)

    if Np != N:
        pad_rows = Np - N
        brdf = jnp.pad(brdf, ((0, pad_rows), (0, 0)))
        viewdirs = jnp.pad(viewdirs, ((0, pad_rows), (0, 0)))

    packed = _ref_mlp_pallas(brdf, viewdirs, w1, b1, w2, b2, tile_n=tn)
    ref_vec = packed[:N, 0:3]
    norm_pred = packed[:N, 3:6]
    return ref_vec, norm_pred


def init_params(key, in_dim, hid):
    """Deterministic synthetic params with torch.nn.Linear shapes.

    torch stores W as [out, in]; we keep y = x @ W.T + b by generating
    [out, in] and transposing once (in plain JAX, outside the kernel).
    """
    k1, k2, k3, k4 = jax.random.split(key, 4)
    w1_t = jax.random.normal(k1, (hid, in_dim), jnp.float32) * 0.1   # [out, in]
    b1 = jax.random.normal(k2, (hid,), jnp.float32) * 0.1
    w2_t = jax.random.normal(k3, (3, hid), jnp.float32) * 0.1
    b2 = jax.random.normal(k4, (3,), jnp.float32) * 0.1
    return (w1_t.T, b1.reshape(1, hid), w2_t.T, b2.reshape(1, 3))


def ref_mlp_reference(brdf, viewdirs, w1, b1, w2, b2):
    """Pure-JAX reference of the PyTorch forward."""
    h = jnp.maximum(brdf @ w1 + b1, 0.0)
    p = jnp.tanh(h @ w2 + b2)
    p = p / jnp.linalg.norm(p, axis=1, keepdims=True)
    r = 2.0 * jnp.sum(p * viewdirs, axis=-1, keepdims=True) * p - viewdirs
    r = r / jnp.linalg.norm(r, axis=1, keepdims=True)
    return r, p


if __name__ == "__main__":
    # Module config: brdf_fea=32, viewpe=4 -> in_dim = 32 + 2*4*3 = 56
    brdf_fea = 32
    viewpe = 4
    in_dim = brdf_fea + 2 * viewpe * 3
    N = 256  # small test batch; tile shrinks automatically

    key = jax.random.PRNGKey(0)
    kx, kv, kp = jax.random.split(key, 3)

    brdf = jax.random.normal(kx, (N, in_dim), jnp.float32)
    viewdirs = jax.random.normal(kv, (N, 3), jnp.float32)
    viewdirs = viewdirs / jnp.linalg.norm(viewdirs, axis=1, keepdims=True)

    w1, b1, w2, b2 = init_params(kp, in_dim, brdf_fea)

    ref_vec, norm_pred = ref_mlp_forward(brdf, viewdirs, w1, b1, w2, b2)
    jax.block_until_ready((ref_vec, norm_pred))

    # Correctness vs pure-JAX reference (rsqrt vs sqrt+div ordering tolerance).
    r_ref, p_ref = ref_mlp_reference(brdf, viewdirs, w1, b1, w2, b2)
    assert jnp.allclose(ref_vec, r_ref, atol=1e-4, rtol=1e-4)
    assert jnp.allclose(norm_pred, p_ref, atol=1e-4, rtol=1e-4)

    print("KERNEL_OK")
</pallas_src>

<mosaic_0001>
module attributes {stable_mosaic.version = 11 : i64} {
  func.func @_ref_mlp_kernel(%arg0: i32, %arg1: memref<256x56xf32, #tpu.memory_space<vmem>>, %arg2: memref<256x3xf32, #tpu.memory_space<vmem>>, %arg3: memref<56x32xf32, #tpu.memory_space<vmem>>, %arg4: memref<1x32xf32, #tpu.memory_space<vmem>>, %arg5: memref<32x3xf32, #tpu.memory_space<vmem>>, %arg6: memref<1x3xf32, #tpu.memory_space<vmem>>, %arg7: memref<256x8xf32, #tpu.memory_space<vmem>>) attributes {dimension_semantics = [#tpu.dimension_semantics<parallel>], iteration_bounds = array<i64: 1>, scalar_prefetch = 0 : i64, scratch_operands = 0 : i64, tpu.core_type = #tpu.core_type<tc>, window_params = [{transform_indices = @transform_0, window_bounds = array<i64: 256, 56>}, {transform_indices = @transform_1, window_bounds = array<i64: 256, 3>}, {pipeline_mode = #tpu.pipeline_mode<synchronous>, transform_indices = @transform_2, window_bounds = array<i64: 56, 32>}, {pipeline_mode = #tpu.pipeline_mode<synchronous>, transform_indices = @transform_3, window_bounds = array<i64: 1, 32>}, {pipeline_mode = #tpu.pipeline_mode<synchronous>, transform_indices = @transform_4, window_bounds = array<i64: 32, 3>}, {pipeline_mode = #tpu.pipeline_mode<synchronous>, transform_indices = @transform_5, window_bounds = array<i64: 1, 3>}, {transform_indices = @transform_6, window_bounds = array<i64: 256, 8>}]} {
    %c0 = arith.constant 0 : index
    %c0_0 = arith.constant 0 : index
    %0 = vector.load %arg1[%c0, %c0_0] : memref<256x56xf32, #tpu.memory_space<vmem>>, vector<256x56xf32>
    %c0_1 = arith.constant 0 : index
    %c0_2 = arith.constant 0 : index
    %1 = vector.load %arg2[%c0_1, %c0_2] : memref<256x3xf32, #tpu.memory_space<vmem>>, vector<256x3xf32>
    %c0_3 = arith.constant 0 : index
    %c0_4 = arith.constant 0 : index
    %2 = vector.load %arg3[%c0_3, %c0_4] : memref<56x32xf32, #tpu.memory_space<vmem>>, vector<56x32xf32>
    %cst = arith.constant dense<0.000000e+00> : vector<256x32xf32>
    %3 = tpu.matmul %0, %2, %cst {dimension_numbers = #tpu.dot_dimension_numbers<[1], [0], [0], [1], [0, 0, 1, 1], [], []>} : vector<256x56xf32>, vector<56x32xf32>, vector<256x32xf32> -> vector<256x32xf32>
    %c0_5 = arith.constant 0 : index
    %c0_6 = arith.constant 0 : index
    %4 = vector.load %arg4[%c0_5, %c0_6] : memref<1x32xf32, #tpu.memory_space<vmem>>, vector<1x32xf32>
    %5 = vector.broadcast %4 : vector<1x32xf32> to vector<256x32xf32>
    %6 = arith.addf %3, %5 : vector<256x32xf32>
    %cst_7 = arith.constant 0.000000e+00 : f32
    %7 = vector.broadcast %cst_7 : f32 to vector<256x32xf32>
    %8 = arith.maximumf %6, %7 : vector<256x32xf32>
    %c0_8 = arith.constant 0 : index
    %c0_9 = arith.constant 0 : index
    %9 = vector.load %arg5[%c0_8, %c0_9] : memref<32x3xf32, #tpu.memory_space<vmem>>, vector<32x3xf32>
    %cst_10 = arith.constant dense<0.000000e+00> : vector<256x3xf32>
    %10 = tpu.matmul %8, %9, %cst_10 {dimension_numbers = #tpu.dot_dimension_numbers<[1], [0], [0], [1], [0, 0, 1, 1], [], []>} : vector<256x32xf32>, vector<32x3xf32>, vector<256x3xf32> -> vector<256x3xf32>
    %c0_11 = arith.constant 0 : index
    %c0_12 = arith.constant 0 : index
    %11 = vector.load %arg6[%c0_11, %c0_12] : memref<1x3xf32, #tpu.memory_space<vmem>>, vector<1x3xf32>
    %12 = vector.broadcast %11 : vector<1x3xf32> to vector<256x3xf32>
    %13 = arith.addf %10, %12 : vector<256x3xf32>
    %14 = math.tanh %13 : vector<256x3xf32>
    %15 = arith.mulf %14, %14 : vector<256x3xf32>
    %cst_13 = arith.constant dense<0.000000e+00> : vector<256xf32>
    %16 = vector.multi_reduction <add>, %15, %cst_13 [1] : vector<256x3xf32> to vector<256xf32>
    %17 = vector.shape_cast %16 : vector<256xf32> to vector<256x1xf32>
    %18 = math.rsqrt %17 : vector<256x1xf32>
    %19 = vector.broadcast %18 : vector<256x1xf32> to vector<256x3xf32>
    %20 = arith.mulf %14, %19 : vector<256x3xf32>
    %21 = arith.mulf %20, %1 : vector<256x3xf32>
    %cst_14 = arith.constant dense<0.000000e+00> : vector<256xf32>
    %22 = vector.multi_reduction <add>, %21, %cst_14 [1] : vector<256x3xf32> to vector<256xf32>
    %23 = vector.shape_cast %22 : vector<256xf32> to vector<256x1xf32>
    %cst_15 = arith.constant 2.000000e+00 : f32
    %24 = vector.broadcast %cst_15 : f32 to vector<256x1xf32>
    %25 = arith.mulf %24, %23 : vector<256x1xf32>
    %26 = vector.broadcast %25 : vector<256x1xf32> to vector<256x3xf32>
    %27 = arith.mulf %26, %20 : vector<256x3xf32>
    %28 = arith.subf %27, %1 : vector<256x3xf32>
    %29 = arith.mulf %28, %28 : vector<256x3xf32>
    %cst_16 = arith.constant dense<0.000000e+00> : vector<256xf32>
    %30 = vector.multi_reduction <add>, %29, %cst_16 [1] : vector<256x3xf32> to vector<256xf32>
    %31 = vector.shape_cast %30 : vector<256xf32> to vector<256x1xf32>
    %32 = math.rsqrt %31 : vector<256x1xf32>
    %33 = vector.broadcast %32 : vector<256x1xf32> to vector<256x3xf32>
    %34 = arith.mulf %28, %33 : vector<256x3xf32>
    %cst_17 = arith.constant 0.000000e+00 : f32
    %35 = vector.broadcast %cst_17 : f32 to vector<256x2xf32>
    %36 = tpu.concatenate %34, %20, %35 in 1 : vector<256x3xf32>, vector<256x3xf32>, vector<256x2xf32> -> vector<256x8xf32>
    %c0_18 = arith.constant 0 : index
    %c0_19 = arith.constant 0 : index
    %37 = vector.load %arg7[%c0_18, %c0_19] : memref<256x8xf32, #tpu.memory_space<vmem>>, vector<256x8xf32>
    tpu.vector_store %arg7[%c0_18, %c0_19], %36 {strides = array<i32>} : memref<256x8xf32, #tpu.memory_space<vmem>>, vector<256x8xf32>,
    return
  }
  func.func @transform_0(%arg0: i32) -> (i32, i32) {
    %c0_i32 = arith.constant 0 : i32
    %c0_i32_0 = arith.constant 0 : i32
    return %arg0, %c0_i32 : i32, i32
  }
  func.func @transform_1(%arg0: i32) -> (i32, i32) {
    %c0_i32 = arith.constant 0 : i32
    %c0_i32_0 = arith.constant 0 : i32
    return %arg0, %c0_i32 : i32, i32
  }
  func.func @transform_2(%arg0: i32) -> (i32, i32) {
    %c0_i32 = arith.constant 0 : i32
    %c0_i32_0 = arith.constant 0 : i32
    %c0_i32_1 = arith.constant 0 : i32
    return %c0_i32, %c0_i32_0 : i32, i32
  }
  func.func @transform_3(%arg0: i32) -> (i32, i32) {
    %c0_i32 = arith.constant 0 : i32
    %c0_i32_0 = arith.constant 0 : i32
    %c0_i32_1 = arith.constant 0 : i32
    return %c0_i32, %c0_i32_0 : i32, i32
  }
  func.func @transform_4(%arg0: i32) -> (i32, i32) {
    %c0_i32 = arith.constant 0 : i32
    %c0_i32_0 = arith.constant 0 : i32
    %c0_i32_1 = arith.constant 0 : i32
    return %c0_i32, %c0_i32_0 : i32, i32
  }
  func.func @transform_5(%arg0: i32) -> (i32, i32) {
    %c0_i32 = arith.constant 0 : i32
    %c0_i32_0 = arith.constant 0 : i32
    %c0_i32_1 = arith.constant 0 : i32
    return %c0_i32, %c0_i32_0 : i32, i32
  }
  func.func @transform_6(%arg0: i32) -> (i32, i32) {
    %c0_i32 = arith.constant 0 : i32
    %c0_i32_0 = arith.constant 0 : i32
    return %arg0, %c0_i32 : i32, i32
  }
}

</mosaic_0001>

<bundles_post_ra>
// kernel: _ref_mlp_pallas.1
= control target key start
LH: loop header
LB: loop body
LE: loop exit
PB: predicated region body
PF: predicated region fallthrough
CT: control target
= control target key end

     0   :  { %vm98_vm0 = vcmask 457728   ;;  %vm348_vm1 = vcmask 261120   ;;  %vm622_vm2 = vcmask 23552   ;;  %s2287_s10 = smov 3   ;;  %s3810_s2 = inlined_call_operand.vmem [shape: f32[56,32], index: 2, kind: input, shape index: {}]   ;;  %s3811_s3 = inlined_call_operand.vmem [shape: f32[1,32], index: 3, kind: input, shape index: {}]   ;;  %s3812_s0 = inlined_call_operand.vmem [shape: f32[256,56], index: 0, kind: input, shape index: {}]   ;;  %s3813_s4 = inlined_call_operand.vmem [shape: f32[32,3], index: 4, kind: input, shape index: {}]   ;;  %s3814_s5 = inlined_call_operand.vmem [shape: f32[1,3], index: 5, kind: input, shape index: {}]   ;;  %s3815_s1 = inlined_call_operand.vmem [shape: f32[256,3], index: 1, kind: input, shape index: {}]   ;;  %s3816_s6 = inlined_call_operand.vmem [shape: f32[256,8], index: 6, kind: output, shape index: {}]  }
   0x1   :  { %v93_v0 = vld [vmem:[%s3810_s2 + $0x30] sm:$0xff]  ;;  %v92_v1 = vld [vmem:[%s3810_s2 + $0x28] sm:$0xff]  ;;  %v91_v2 = vld [vmem:[%s3810_s2 + $0x20] sm:$0xff] }
   0x2   :  { %204 = vmatpush.msra.mxu0 %v93_v0  ;;  %2069 = vmatpush.msra.mxu2 %v93_v0  ;;  %v90_v3 = vld [vmem:[%s3810_s2 + $0x18] sm:$0xff]  ;;  %v89_v4 = vld [vmem:[%s3810_s2 + $0x10] sm:$0xff]  ;;  %v88_v5 = vld [vmem:[%s3810_s2 + $0x8] sm:$0xff] }
   0x3   :  { %v87_v6 = vld [vmem:[%s3810_s2] sm:$0xff]  ;;  %v24_v9 = vld [vmem:[%s3812_s0 + $0x8] sm:$0xff]  ;;  %v25_v11 = vld [vmem:[%s3812_s0 + $0x10] sm:$0xff] }
   0x4   :  { %205 = vmatpush.msra.mxu0 %v92_v1  ;;  %2070 = vmatpush.msra.mxu2 %v92_v1  ;;  %v23_v7 = vld [vmem:[%s3812_s0] sm:$0xff]  ;;  %v40_v10 = vld [vmem:[%s3812_s0 + $0x88] sm:$0xff]  ;;  %v41_v12 = vld [vmem:[%s3812_s0 + $0x90] sm:$0xff] }
   0x5   :  { %v39_v8 = vld [vmem:[%s3812_s0 + $0x80] sm:$0xff]  ;;  %v26_v13 = vld [vmem:[%s3812_s0 + $0x18] sm:$0xff]  ;;  %v28_v17 = vld [vmem:[%s3812_s0 + $0x28] sm:$0xff] }
   0x6   :  { %206 = vmatpush.msra.mxu0 %v91_v2  ;;  %2071 = vmatpush.msra.mxu2 %v91_v2  ;;  %v42_v14 = vld [vmem:[%s3812_s0 + $0x98] sm:$0xff]  ;;  %v27_v15 = vld [vmem:[%s3812_s0 + $0x20] sm:$0xff]  ;;  %v44_v18 = vld [vmem:[%s3812_s0 + $0xa8] sm:$0xff] }
   0x7   :  { %v43_v16 = vld [vmem:[%s3812_s0 + $0xa0] sm:$0xff]  ;;  %v29_v19 = vld [vmem:[%s3812_s0 + $0x30] sm:$0xff]  ;;  %v30_v21 = vld [vmem:[%s3812_s0 + $0x38] sm:$0xff] }
   0x8   :  { %207 = vmatpush.msra.mxu0 %v90_v3  ;;  %2072 = vmatpush.msra.mxu2 %v90_v3  ;;  %v45_v20 = vld [vmem:[%s3812_s0 + $0xb0] sm:$0xff]  ;;  %v46_v22 = vld [vmem:[%s3812_s0 + $0xb8] sm:$0xff]  ;;  %v31_v23 = vld [vmem:[%s3812_s0 + $0x40] sm:$0xff] }
   0x9   :  { %v47_v24 = vld [vmem:[%s3812_s0 + $0xc0] sm:$0xff]  ;;  %v32_v25 = vld [vmem:[%s3812_s0 + $0x48] sm:$0xff]  ;;  %v33_v27 = vld [vmem:[%s3812_s0 + $0x50] sm:$0xff] }
   0xa   :  { %208 = vmatpush.msra.mxu0 %v89_v4  ;;  %2073 = vmatpush.msra.mxu2 %v89_v4  ;;  %v48_v26 = vld [vmem:[%s3812_s0 + $0xc8] sm:$0xff]  ;;  %v49_v28 = vld [vmem:[%s3812_s0 + $0xd0] sm:$0xff]  ;;  %v34_v29 = vld [vmem:[%s3812_s0 + $0x58] sm:$0xff] }
   0xb   :  { %v50_v30 = vld [vmem:[%s3812_s0 + $0xd8] sm:$0xff]  ;;  %v342_v32 = vld [vmem:[%s3813_s4 + $0x10] sm:$0xff]  ;;  %v35_v33 = vld [vmem:[%s3812_s0 + $0x60] sm:$0xff] }
   0xc   :  { %209 = vmatpush.msra.mxu0 %v88_v5  ;;  %2074 = vmatpush.msra.mxu2 %v88_v5  ;;  %v343_v31 = vld [vmem:[%s3813_s4 + $0x18] sm:$0xff]  ;;  %v51_v34 = vld [vmem:[%s3812_s0 + $0xe0] sm:$0xff]  ;;  %v341_v35 = vld [vmem:[%s3813_s4 + $0x8] sm:$0xff] }
   0xd   :  { %457 = vmatpush.msra.mxu1 %v343_v31  ;;  %2076 = vmatpush.msra.mxu3 %v343_v31  ;;  %v340_v36 = vld [vmem:[%s3813_s4] sm:$0xff]  ;;  %v36_v37 = vld [vmem:[%s3812_s0 + $0x68] sm:$0xff]  ;;  %v37_v39 = vld [vmem:[%s3812_s0 + $0x70] sm:$0xff] }
   0xe   :  { %210 = vmatpush.msra.mxu0 %v87_v6  ;;  %2075 = vmatpush.msra.mxu2 %v87_v6  ;;  %v52_v38 = vld [vmem:[%s3812_s0 + $0xe8] sm:$0xff]  ;;  %v53_v40 = vld [vmem:[%s3812_s0 + $0xf0] sm:$0xff]  ;;  %v38_v41 = vld [vmem:[%s3812_s0 + $0x78] sm:$0xff] }
   0xf   :  { %2005 = vmatmul.msk.f32.vlgmr.msra.gmra.mxu0 %vm98_vm0, %v23_v7  ;;  %2021 = vmatmul.msk.f32.vlgmr.msra.gmra.mxu2 %vm98_vm0, %v39_v8  ;;  %v54_v42 = vld [vmem:[%s3812_s0 + $0xf8] sm:$0xff]  ;;  %v2487_v43 = vld [vmem:[%s3811_s3] ss:$0 sm:$0xff] }
  0x10   :  { %458 = vmatpush.msra.mxu1 %v342_v32  ;;  %2077 = vmatpush.msra.mxu3 %v342_v32 }
  0x12   :  { %459 = vmatpush.msra.mxu1 %v341_v35  ;;  %2078 = vmatpush.msra.mxu3 %v341_v35 }
  0x14   :  { %460 = vmatpush.msra.mxu1 %v340_v36  ;;  %2079 = vmatpush.msra.mxu3 %v340_v36 }
  0x17   :  { %2006 = vmatmul.msk.f32.gmra.mxu0 %vm98_vm0, %v24_v9  ;;  %2022 = vmatmul.msk.f32.gmra.mxu2 %vm98_vm0, %v40_v10 }
  0x1f   :  { %2007 = vmatmul.msk.f32.gmra.mxu0 %vm98_vm0, %v25_v11  ;;  %2023 = vmatmul.msk.f32.gmra.mxu2 %vm98_vm0, %v41_v12 }
  0x27   :  { %2008 = vmatmul.msk.f32.gmra.mxu0 %vm98_vm0, %v26_v13  ;;  %2024 = vmatmul.msk.f32.gmra.mxu2 %vm98_vm0, %v42_v14 }
  0x2f   :  { %2009 = vmatmul.msk.f32.gmra.mxu0 %vm98_vm0, %v27_v15  ;;  %2025 = vmatmul.msk.f32.gmra.mxu2 %vm98_vm0, %v43_v16 }
  0x37   :  { %2010 = vmatmul.msk.f32.gmra.mxu0 %vm98_vm0, %v28_v17  ;;  %2026 = vmatmul.msk.f32.gmra.mxu2 %vm98_vm0, %v44_v18 }
  0x3f   :  { %2011 = vmatmul.msk.f32.gmra.mxu0 %vm98_vm0, %v29_v19  ;;  %2027 = vmatmul.msk.f32.gmra.mxu2 %vm98_vm0, %v45_v20 }
  0x47   :  { %2012 = vmatmul.msk.f32.gmra.mxu0 %vm98_vm0, %v30_v21  ;;  %2028 = vmatmul.msk.f32.gmra.mxu2 %vm98_vm0, %v46_v22 }
  0x4f   :  { %2013 = vmatmul.msk.f32.gmra.mxu0 %vm98_vm0, %v31_v23  ;;  %2029 = vmatmul.msk.f32.gmra.mxu2 %vm98_vm0, %v47_v24 }
  0x57   :  { %2014 = vmatmul.msk.f32.gmra.mxu0 %vm98_vm0, %v32_v25  ;;  %2030 = vmatmul.msk.f32.gmra.mxu2 %vm98_vm0, %v48_v26 }
  0x5f   :  { %2015 = vmatmul.msk.f32.gmra.mxu0 %vm98_vm0, %v33_v27  ;;  %2031 = vmatmul.msk.f32.gmra.mxu2 %vm98_vm0, %v49_v28 }
  0x67   :  { %2016 = vmatmul.msk.f32.gmra.mxu0 %vm98_vm0, %v34_v29  ;;  %2032 = vmatmul.msk.f32.gmra.mxu2 %vm98_vm0, %v50_v30 }
  0x6f   :  { %2017 = vmatmul.msk.f32.gmra.mxu0 %vm98_vm0, %v35_v33  ;;  %2033 = vmatmul.msk.f32.gmra.mxu2 %vm98_vm0, %v51_v34 }
  0x77   :  { %2018 = vmatmul.msk.f32.gmra.mxu0 %vm98_vm0, %v36_v37  ;;  %2034 = vmatmul.msk.f32.gmra.mxu2 %vm98_vm0, %v52_v38 }
  0x7f   :  { %2019 = vmatmul.msk.f32.gmra.mxu0 %vm98_vm0, %v37_v39  ;;  %2035 = vmatmul.msk.f32.gmra.mxu2 %vm98_vm0, %v53_v40 }
  0x87   :  { %2020 = vmatmul.msk.f32.gmra.mxu0 %vm98_vm0, %v38_v41  ;;  %2036 = vmatmul.msk.f32.gmra.mxu2 %vm98_vm0, %v54_v42 }
  0x8c   :  { %v212_v44 = vpop.f32.mrf.mxu0 }
  0x8d   :  { %v213_v45 = vadd.f32 %v2487_v43, %v212_v44 }
  0x8f   :  { %v308_v46 = vmax.f32 %v213_v45, 0.0 }
  0x91   :  { %2037 = vmatmul.msk.f32.vlgmr.msra.gmra.mxu1 %vm348_vm1, %v308_v46 }
  0x92   :  { %v2491_v47 = vpop.f32.mrf.mxu2 }
  0x94   :  { %v215_v48 = vpop.f32.mrf.mxu0 }
  0x95   :  { %v216_v49 = vadd.f32 %v2487_v43, %v215_v48 }
  0x97   :  { %v309_v50 = vmax.f32 %v216_v49, 0.0 }
  0x99   :  { %2038 = vmatmul.msk.f32.gmra.mxu1 %vm348_vm1, %v309_v50 }
  0x9a   :  { %v263_v51 = vpop.f32.mrf.mxu2 }
  0x9b   :  { %v264_v52 = vadd.f32 %v2487_v43, %v263_v51 }
  0x9c   :  { %v218_v53 = vpop.f32.mrf.mxu0 }
  0x9d   :  { %v325_v54 = vmax.f32 %v264_v52, 0.0  ;;  %v219_v55 = vadd.f32 %v2487_v43, %v218_v53 }
  0x9f   :  { %v310_v56 = vmax.f32 %v219_v55, 0.0  ;;  %2054 = vmatmul.msk.f32.vlgmr.msra.gmra.mxu3 %vm348_vm1, %v325_v54 }
  0xa1   :  { %2039 = vmatmul.msk.f32.gmra.mxu1 %vm348_vm1, %v310_v56 }
  0xa2   :  { %v266_v57 = vpop.f32.mrf.mxu2 }
  0xa3   :  { %v267_v58 = vadd.f32 %v2487_v43, %v266_v57 }
  0xa4   :  { %v221_v59 = vpop.f32.mrf.mxu0 }
  0xa5   :  { %v326_v60 = vmax.f32 %v267_v58, 0.0  ;;  %v222_v61 = vadd.f32 %v2487_v43, %v221_v59 }
  0xa7   :  { %v311_v62 = vmax.f32 %v222_v61, 0.0  ;;  %2055 = vmatmul.msk.f32.gmra.mxu3 %vm348_vm1, %v326_v60 }
  0xa9   :  { %2040 = vmatmul.msk.f32.gmra.mxu1 %vm348_vm1, %v311_v62 }
  0xaa   :  { %v269_v63 = vpop.f32.mrf.mxu2 }
  0xab   :  { %v270_v0 = vadd.f32 %v2487_v43, %v269_v63 }
  0xac   :  { %v224_v1 = vpop.f32.mrf.mxu0 }
  0xad   :  { %v327_v2 = vmax.f32 %v270_v0, 0.0  ;;  %v225_v3 = vadd.f32 %v2487_v43, %v224_v1 }
  0xaf   :  { %v312_v4 = vmax.f32 %v225_v3, 0.0  ;;  %2056 = vmatmul.msk.f32.gmra.mxu3 %vm348_vm1, %v327_v2 }
  0xb1   :  { %2041 = vmatmul.msk.f32.gmra.mxu1 %vm348_vm1, %v312_v4 }
  0xb2   :  { %v272_v5 = vpop.f32.mrf.mxu2 }
  0xb3   :  { %v273_v6 = vadd.f32 %v2487_v43, %v272_v5 }
  0xb4   :  { %v227_v7 = vpop.f32.mrf.mxu0 }
  0xb5   :  { %v228_v8 = vadd.f32 %v2487_v43, %v227_v7  ;;  %v328_v9 = vmax.f32 %v273_v6, 0.0 }
  0xb7   :  { %v313_v10 = vmax.f32 %v228_v8, 0.0  ;;  %2057 = vmatmul.msk.f32.gmra.mxu3 %vm348_vm1, %v328_v9 }
  0xb9   :  { %2042 = vmatmul.msk.f32.gmra.mxu1 %vm348_vm1, %v313_v10  ;;  %v261_v10 = vadd.f32 %v2487_v43, %v2491_v47 }
  0xba   :  { %v275_v11 = vpop.f32.mrf.mxu2 }
  0xbb   :  { %v276_v12 = vadd.f32 %v2487_v43, %v275_v11 }
  0xbc   :  { %v230_v13 = vpop.f32.mrf.mxu0 }
  0xbd   :  { %v231_v14 = vadd.f32 %v2487_v43, %v230_v13  ;;  %v329_v15 = vmax.f32 %v276_v12, 0.0  ;;  %v2557_v12 = vld [vmem:[%s3814_s5] ss:$0 sm:$0xff] }
  0xbf   :  { %v314_v16 = vmax.f32 %v231_v14, 0.0  ;;  %2058 = vmatmul.msk.f32.gmra.mxu3 %vm348_vm1, %v329_v15  ;;  %v324_v15 = vmax.f32 %v261_v10, 0.0 }
  0xc1   :  { %2043 = vmatmul.msk.f32.gmra.mxu1 %vm348_vm1, %v314_v16 }
  0xc2   :  { %v278_v17 = vpop.f32.mrf.mxu2 }
  0xc3   :  { %v279_v18 = vadd.f32 %v2487_v43, %v278_v17 }
  0xc4   :  { %v233_v19 = vpop.f32.mrf.mxu0 }
  0xc5   :  { %v234_v20 = vadd.f32 %v2487_v43, %v233_v19  ;;  %v330_v21 = vmax.f32 %v279_v18, 0.0 }
  0xc7   :  { %v315_v22 = vmax.f32 %v234_v20, 0.0  ;;  %2059 = vmatmul.msk.f32.gmra.mxu3 %vm348_vm1, %v330_v21 }
  0xc9   :  { %2044 = vmatmul.msk.f32.gmra.mxu1 %vm348_vm1, %v315_v22 }
  0xca   :  { %v281_v23 = vpop.f32.mrf.mxu2 }
  0xcb   :  { %v282_v24 = vadd.f32 %v2487_v43, %v281_v23 }
  0xcc   :  { %v236_v25 = vpop.f32.mrf.mxu0 }
  0xcd   :  { %v237_v26 = vadd.f32 %v2487_v43, %v236_v25  ;;  %v331_v27 = vmax.f32 %v282_v24, 0.0 }
  0xcf   :  { %v316_v28 = vmax.f32 %v237_v26, 0.0  ;;  %2060 = vmatmul.msk.f32.gmra.mxu3 %vm348_vm1, %v331_v27 }
  0xd1   :  { %2045 = vmatmul.msk.f32.gmra.mxu1 %vm348_vm1, %v316_v28 }
  0xd2   :  { %v284_v29 = vpop.f32.mrf.mxu2 }
  0xd3   :  { %v285_v30 = vadd.f32 %v2487_v43, %v284_v29 }
  0xd4   :  { %v239_v31 = vpop.f32.mrf.mxu0 }
  0xd5   :  { %v240_v32 = vadd.f32 %v2487_v43, %v239_v31  ;;  %v332_v33 = vmax.f32 %v285_v30, 0.0 }
  0xd7   :  { %v317_v34 = vmax.f32 %v240_v32, 0.0  ;;  %2061 = vmatmul.msk.f32.gmra.mxu3 %vm348_vm1, %v332_v33 }
  0xd9   :  { %2046 = vmatmul.msk.f32.gmra.mxu1 %vm348_vm1, %v317_v34 }
  0xda   :  { %v287_v35 = vpop.f32.mrf.mxu2 }
  0xdb   :  { %v288_v36 = vadd.f32 %v2487_v43, %v287_v35 }
  0xdc   :  { %v242_v37 = vpop.f32.mrf.mxu0 }
  0xdd   :  { %v243_v38 = vadd.f32 %v2487_v43, %v242_v37  ;;  %v333_v39 = vmax.f32 %v288_v36, 0.0 }
  0xdf   :  { %v318_v40 = vmax.f32 %v243_v38, 0.0  ;;  %2062 = vmatmul.msk.f32.gmra.mxu3 %vm348_vm1, %v333_v39 }
  0xe1   :  { %2047 = vmatmul.msk.f32.gmra.mxu1 %vm348_vm1, %v318_v40 }
  0xe2   :  { %v290_v41 = vpop.f32.mrf.mxu2 }
  0xe3   :  { %v291_v42 = vadd.f32 %v2487_v43, %v290_v41 }
  0xe4   :  { %v245_v44 = vpop.f32.mrf.mxu0 }
  0xe5   :  { %v246_v45 = vadd.f32 %v2487_v43, %v245_v44  ;;  %v334_v46 = vmax.f32 %v291_v42, 0.0 }
  0xe7   :  { %v319_v48 = vmax.f32 %v246_v45, 0.0  ;;  %2063 = vmatmul.msk.f32.gmra.mxu3 %vm348_vm1, %v334_v46 }
  0xe9   :  { %2048 = vmatmul.msk.f32.gmra.mxu1 %vm348_vm1, %v319_v48 }
  0xea   :  { %v293_v49 = vpop.f32.mrf.mxu2 }
  0xeb   :  { %v294_v50 = vadd.f32 %v2487_v43, %v293_v49 }
  0xec   :  { %v248_v51 = vpop.f32.mrf.mxu0 }
  0xed   :  { %v249_v52 = vadd.f32 %v2487_v43, %v248_v51  ;;  %v335_v53 = vmax.f32 %v294_v50, 0.0 }
  0xef   :  { %v320_v54 = vmax.f32 %v249_v52, 0.0  ;;  %2064 = vmatmul.msk.f32.gmra.mxu3 %vm348_vm1, %v335_v53 }
  0xf1   :  { %2049 = vmatmul.msk.f32.gmra.mxu1 %vm348_vm1, %v320_v54 }
  0xf2   :  { %v296_v55 = vpop.f32.mrf.mxu2 }
  0xf3   :  { %v297_v56 = vadd.f32 %v2487_v43, %v296_v55 }
  0xf4   :  { %v251_v57 = vpop.f32.mrf.mxu0 }
  0xf5   :  { %v252_v58 = vadd.f32 %v2487_v43, %v251_v57  ;;  %v336_v59 = vmax.f32 %v297_v56, 0.0 }
  0xf7   :  { %v321_v60 = vmax.f32 %v252_v58, 0.0  ;;  %2065 = vmatmul.msk.f32.gmra.mxu3 %vm348_vm1, %v336_v59 }
  0xf9   :  { %2050 = vmatmul.msk.f32.gmra.mxu1 %vm348_vm1, %v321_v60 }
  0xfa   :  { %v299_v61 = vpop.f32.mrf.mxu2 }
  0xfb   :  { %v300_v62 = vadd.f32 %v2487_v43, %v299_v61 }
  0xfc   :  { %v254_v63 = vpop.f32.mrf.mxu0 }
  0xfd   :  { %v255_v0 = vadd.f32 %v2487_v43, %v254_v63  ;;  %v337_v1 = vmax.f32 %v300_v62, 0.0 }
  0xff   :  { %v322_v2 = vmax.f32 %v255_v0, 0.0  ;;  %2066 = vmatmul.msk.f32.gmra.mxu3 %vm348_vm1, %v337_v1 }
 0x101   :  { %2051 = vmatmul.msk.f32.gmra.mxu1 %vm348_vm1, %v322_v2 }
 0x102   :  { %v302_v3 = vpop.f32.mrf.mxu2 }
 0x103   :  { %v303_v4 = vadd.f32 %v2487_v43, %v302_v3 }
 0x104   :  { %v257_v5 = vpop.f32.mrf.mxu0 }
 0x105   :  { %v258_v6 = vadd.f32 %v2487_v43, %v257_v5  ;;  %v338_v7 = vmax.f32 %v303_v4, 0.0 }
 0x107   :  { %v323_v8 = vmax.f32 %v258_v6, 0.0  ;;  %2067 = vmatmul.msk.f32.gmra.mxu3 %vm348_vm1, %v338_v7 }
 0x109   :  { %2052 = vmatmul.msk.f32.gmra.mxu1 %vm348_vm1, %v323_v8 }
 0x10a   :  { %v305_v9 = vpop.f32.mrf.mxu2 }
 0x10b   :  { %v306_v11 = vadd.f32 %v2487_v43, %v305_v9 }
 0x10d   :  { %v339_v13 = vmax.f32 %v306_v11, 0.0 }
 0x10e   :  { %v462_v14 = vpop.f32.mrf.mxu1 }
 0x10f   :  { %v463_v16 = vadd.f32 %v2557_v12, %v462_v14  ;;  %2068 = vmatmul.msk.f32.gmra.mxu3 %vm348_vm1, %v339_v13 }
 0x111   :  { %2083 = vtanh.f32 %v463_v16  ;;  %2053 = vmatmul.msk.f32.gmra.mxu1 %vm348_vm1, %v324_v15 }
 0x116   :  { %v465_v17 = vpop.f32.mrf.mxu1 }
 0x117   :  { %v2562_v18 = vpop.eup %2083  ;;  %v466_v43 = vadd.f32 %v2557_v12, %v465_v17 }
 0x118   :  { %v590_v47 = vmul.f32 %v2562_v18, %v2562_v18 }
 0x119   :  { %2085 = vtanh.f32 %v466_v43 }
 0x11a   :  { %v623_v19 = vsel %vm622_vm2, %v590_v47, 0.0 }
 0x11b   :  { %624 = vadd.xlane.f32.xlu0 %v623_v19 }
 0x11e   :  { %v468_v20 = vpop.f32.mrf.mxu1 }
 0x11f   :  { %v2568_v21 = vpop.eup %2085  ;;  %v469_v22 = vadd.f32 %v2557_v12, %v468_v20 }
 0x120   :  { %v591_v23 = vmul.f32 %v2568_v21, %v2568_v21 }
 0x121   :  { %2087 = vtanh.f32 %v469_v22 }
 0x122   :  { %v513_v24 = vpop.f32.mrf.mxu3  ;;  %v626_v25 = vsel %vm622_vm2, %v591_v23, 0.0 }
 0x123   :  { %v514_v26 = vadd.f32 %v2557_v12, %v513_v24  ;;  %627 = vadd.xlane.f32.xlu0 %v626_v25 }
 0x125   :  { %2089 = vtanh.f32 %v514_v26 }
 0x126   :  { %v471_v27 = vpop.f32.mrf.mxu1 }
 0x127   :  { %v2575_v28 = vpop.eup %2087  ;;  %v472_v29 = vadd.f32 %v2557_v12, %v471_v27 }
 0x128   :  { %v592_v30 = vmul.f32 %v2575_v28, %v2575_v28 }
 0x129   :  { %2091 = vtanh.f32 %v472_v29 }
 0x12a   :  { %v516_v31 = vpop.f32.mrf.mxu3  ;;  %v629_v32 = vsel %vm622_vm2, %v592_v30, 0.0 }
 0x12b   :  { %v2581_v33 = vpop.eup %2089  ;;  %v517_v34 = vadd.f32 %v2557_v12, %v516_v31  ;;  %630 = vadd.xlane.f32.xlu1 %v629_v32 }
 0x12c   :  { %v607_v35 = vmul.f32 %v2581_v33, %v2581_v33 }
 0x12d   :  { %2093 = vtanh.f32 %v517_v34 }
 0x12e   :  { %v474_v36 = vpop.f32.mrf.mxu1  ;;  %v674_v37 = vsel %vm622_vm2, %v607_v35, 0.0 }
 0x12f   :  { %v2587_v38 = vpop.eup %2091  ;;  %v475_v39 = vadd.f32 %v2557_v12, %v474_v36  ;;  %675 = vadd.xlane.f32.xlu2 %v674_v37 }
 0x130   :  { %v593_v40 = vmul.f32 %v2587_v38, %v2587_v38 }
 0x131   :  { %2095 = vtanh.f32 %v475_v39 }
 0x132   :  { %v519_v41 = vpop.f32.mrf.mxu3  ;;  %v632_v42 = vsel %vm622_vm2, %v593_v40, 0.0 }
 0x133   :  { %v2593_v44 = vpop.eup %2093  ;;  %v520_v45 = vadd.f32 %v2557_v12, %v519_v41  ;;  %633 = vadd.xlane.f32.xlu1 %v632_v42 }
 0x134   :  { %v608_v46 = vmul.f32 %v2593_v44, %v2593_v44 }
 0x135   :  { %2097 = vtanh.f32 %v520_v45 }
 0x136   :  { %v477_v48 = vpop.f32.mrf.mxu1  ;;  %v677_v49 = vsel %vm622_vm2, %v608_v46, 0.0 }
 0x137   :  { %v2599_v50 = vpop.eup %2095  ;;  %v478_v51 = vadd.f32 %v2557_v12, %v477_v48  ;;  %678 = vadd.xlane.f32.xlu0 %v677_v49 }
 0x138   :  { %v594_v52 = vmul.f32 %v2599_v50, %v2599_v50 }
 0x139   :  { %2099 = vtanh.f32 %v478_v51 }
 0x13a   :  { %v635_v53 = vsel %vm622_vm2, %v594_v52, 0.0  ;;  %v522_v54 = vpop.f32.mrf.mxu3 }
 0x13b   :  { %v2605_v55 = vpop.eup %2097  ;;  %636 = vadd.xlane.f32.xlu2 %v635_v53  ;;  %v523_v56 = vadd.f32 %v2557_v12, %v522_v54 }
 0x13c   :  { %v609_v57 = vmul.f32 %v2605_v55, %v2605_v55 }
 0x13d   :  { %2101 = vtanh.f32 %v523_v56 }
 0x13e   :  { %v480_v58 = vpop.f32.mrf.mxu1  ;;  %v680_v59 = vsel %vm622_vm2, %v609_v57, 0.0 }
 0x13f   :  { %v2611_v60 = vpop.eup %2099  ;;  %v481_v61 = vadd.f32 %v2557_v12, %v480_v58  ;;  %681 = vadd.xlane.f32.xlu1 %v680_v59 }
 0x140   :  { %v595_v62 = vmul.f32 %v2611_v60, %v2611_v60 }
 0x141   :  { %2103 = vtanh.f32 %v481_v61 }
 0x142   :  { %v638_v63 = vsel %vm622_vm2, %v595_v62, 0.0  ;;  %v525_v0 = vpop.f32.mrf.mxu3 }
 0x143   :  { %v2617_v1 = vpop.eup %2101  ;;  %639 = vadd.xlane.f32.xlu2 %v638_v63  ;;  %v526_v2 = vadd.f32 %v2557_v12, %v525_v0 }
 0x144   :  { %v610_v3 = vmul.f32 %v2617_v1, %v2617_v1 }
 0x145   :  { %2105 = vtanh.f32 %v526_v2 }
 0x146   :  { %v483_v4 = vpop.f32.mrf.mxu1  ;;  %v683_v7 = vsel %vm622_vm2, %v610_v3, 0.0 }
 0x147   :  { %v2622_v5 = vpop.eup %2103  ;;  %v484_v6 = vadd.f32 %v2557_v12, %v483_v4 }
 0x148   :  { %v596_v8 = vmul.f32 %v2622_v5, %v2622_v5 }
 0x149   :  { %2107 = vtanh.f32 %v484_v6 }
 0x14a   :  { %v641_v9 = vsel %vm622_vm2, %v596_v8, 0.0  ;;  %v528_v10 = vpop.f32.mrf.mxu3 }
 0x14b   :  { %v2629_v11 = vpop.eup %2105  ;;  %684 = vadd.xlane.f32.xlu2 %v683_v7  ;;  %642 = vadd.xlane.f32.xlu0 %v641_v9  ;;  %v529_v13 = vadd.f32 %v2557_v12, %v528_v10 }
 0x14c   :  { %v611_v14 = vmul.f32 %v2629_v11, %v2629_v11 }
 0x14d   :  { %2109 = vtanh.f32 %v529_v13 }
 0x14e   :  { %v486_v15 = vpop.f32.mrf.mxu1  ;;  %v686_v47 = vsel %vm622_vm2, %v611_v14, 0.0 }
 0x14f   :  { %v2634_v16 = vpop.eup %2107  ;;  %v487_v17 = vadd.f32 %v2557_v12, %v486_v15 }
 0x150   :  { %v597_v43 = vmul.f32 %v2634_v16, %v2634_v16 }
 0x151   :  { %2111 = vtanh.f32 %v487_v17 }
 0x152   :  { %v644_v19 = vsel %vm622_vm2, %v597_v43, 0.0  ;;  %v531_v20 = vpop.f32.mrf.mxu3 }
 0x153   :  { %v2641_v22 = vpop.eup %2109  ;;  %645 = vadd.xlane.f32.xlu1 %v644_v19  ;;  %687 = vadd.xlane.f32.xlu0 %v686_v47  ;;  %v532_v23 = vadd.f32 %v2557_v12, %v531_v20 }
 0x154   :  { %v612_v24 = vmul.f32 %v2641_v22, %v2641_v22 }
 0x155   :  { %2113 = vtanh.f32 %v532_v23 }
 0x156   :  { %v489_v25 = vpop.f32.mrf.mxu1  ;;  %v689_v30 = vsel %vm622_vm2, %v612_v24, 0.0 }
 0x157   :  { %v2646_v26 = vpop.eup %2111  ;;  %v490_v27 = vadd.f32 %v2557_v12, %v489_v25 }
 0x158   :  { %v598_v29 = vmul.f32 %v2646_v26, %v2646_v26 }
 0x159   :  { %2115 = vtanh.f32 %v490_v27 }
 0x15a   :  { %v647_v31 = vsel %vm622_vm2, %v598_v29, 0.0  ;;  %v534_v32 = vpop.f32.mrf.mxu3 }
 0x15b   :  { %v2653_v34 = vpop.eup %2113  ;;  %648 = vadd.xlane.f32.xlu2 %v647_v31  ;;  %690 = vadd.xlane.f32.xlu1 %v689_v30  ;;  %v535_v35 = vadd.f32 %v2557_v12, %v534_v32 }
 0x15c   :  { %v613_v36 = vmul.f32 %v2653_v34, %v2653_v34 }
 0x15d   :  { %2117 = vtanh.f32 %v535_v35 }
 0x15e   :  { %v492_v37 = vpop.f32.mrf.mxu1  ;;  %v692_v41 = vsel %vm622_vm2, %v613_v36, 0.0 }
 0x15f   :  { %v2658_v39 = vpop.eup %2115  ;;  %v493_v40 = vadd.f32 %v2557_v12, %v492_v37 }
 0x160   :  { %v599_v42 = vmul.f32 %v2658_v39, %v2658_v39 }
 0x161   :  { %2119 = vtanh.f32 %v493_v40 }
 0x162   :  { %v650_v45 = vsel %vm622_vm2, %v599_v42, 0.0  ;;  %v537_v46 = vpop.f32.mrf.mxu3 }
 0x163   :  { %v2665_v48 = vpop.eup %2117  ;;  %693 = vadd.xlane.f32.xlu2 %v692_v41  ;;  %651 = vadd.xlane.f32.xlu0 %v650_v45  ;;  %v538_v49 = vadd.f32 %v2557_v12, %v537_v46 }
 0x164   :  { %v614_v51 = vmul.f32 %v2665_v48, %v2665_v48 }
 0x165   :  { %2121 = vtanh.f32 %v538_v49 }
 0x166   :  { %v495_v52 = vpop.f32.mrf.mxu1  ;;  %v695_v57 = vsel %vm622_vm2, %v614_v51, 0.0 }
 0x167   :  { %v2670_v53 = vpop.eup %2119  ;;  %v496_v54 = vadd.f32 %v2557_v12, %v495_v52 }
 0x168   :  { %v600_v56 = vmul.f32 %v2670_v53, %v2670_v53 }
 0x169   :  { %2123 = vtanh.f32 %v496_v54 }
 0x16a   :  { %v653_v58 = vsel %vm622_vm2, %v600_v56, 0.0  ;;  %v540_v59 = vpop.f32.mrf.mxu3 }
 0x16b   :  { %v2677_v61 = vpop.eup %2121  ;;  %654 = vadd.xlane.f32.xlu1 %v653_v58  ;;  %696 = vadd.xlane.f32.xlu0 %v695_v57  ;;  %v541_v62 = vadd.f32 %v2557_v12, %v540_v59 }
 0x16c   :  { %v615_v63 = vmul.f32 %v2677_v61, %v2677_v61 }
 0x16d   :  { %2125 = vtanh.f32 %v541_v62 }
 0x16e   :  { %v498_v0 = vpop.f32.mrf.mxu1  ;;  %v698_v6 = vsel %vm622_vm2, %v615_v63, 0.0 }
 0x16f   :  { %v2682_v2 = vpop.eup %2123  ;;  %v499_v3 = vadd.f32 %v2557_v12, %v498_v0 }
 0x170   :  { %v601_v4 = vmul.f32 %v2682_v2, %v2682_v2 }
 0x171   :  { %2127 = vtanh.f32 %v499_v3 }
 0x172   :  { %v656_v7 = vsel %vm622_vm2, %v601_v4, 0.0  ;;  %v543_v8 = vpop.f32.mrf.mxu3 }
 0x173   :  { %v2689_v9 = vpop.eup %2125  ;;  %657 = vadd.xlane.f32.xlu2 %v656_v7  ;;  %699 = vadd.xlane.f32.xlu1 %v698_v6  ;;  %v544_v10 = vadd.f32 %v2557_v12, %v543_v8 }
 0x174   :  { %v616_v13 = vmul.f32 %v2689_v9, %v2689_v9 }
 0x175   :  { %2129 = vtanh.f32 %v544_v10 }
 0x176   :  { %v501_v14 = vpop.f32.mrf.mxu1  ;;  %v701_v43 = vsel %vm622_vm2, %v616_v13, 0.0 }
 0x177   :  { %v2694_v15 = vpop.eup %2127  ;;  %v502_v17 = vadd.f32 %v2557_v12, %v501_v14 }
 0x178   :  { %v602_v47 = vmul.f32 %v2694_v15, %v2694_v15 }
 0x179   :  { %2131 = vtanh.f32 %v502_v17 }
 0x17a   :  { %v659_v19 = vsel %vm622_vm2, %v602_v47, 0.0  ;;  %v546_v20 = vpop.f32.mrf.mxu3 }
 0x17b   :  { %v2701_v23 = vpop.eup %2129  ;;  %702 = vadd.xlane.f32.xlu2 %v701_v43  ;;  %660 = vadd.xlane.f32.xlu0 %v659_v19  ;;  %v547_v24 = vadd.f32 %v2557_v12, %v546_v20 }
 0x17c   :  { %v617_v25 = vmul.f32 %v2701_v23, %v2701_v23 }
 0x17d   :  { %2133 = vtanh.f32 %v547_v24 }
 0x17e   :  { %v504_v27 = vpop.f32.mrf.mxu1  ;;  %v704_v32 = vsel %vm622_vm2, %v617_v25, 0.0 }
 0x17f   :  { %v2706_v29 = vpop.eup %2131  ;;  %v505_v30 = vadd.f32 %v2557_v12, %v504_v27 }
 0x180   :  { %v603_v31 = vmul.f32 %v2706_v29, %v2706_v29 }
 0x181   :  { %2135 = vtanh.f32 %v505_v30 }
 0x182   :  { %v662_v35 = vsel %vm622_vm2, %v603_v31, 0.0  ;;  %v549_v36 = vpop.f32.mrf.mxu3 }
 0x183   :  { %v2713_v37 = vpop.eup %2133  ;;  %663 = vadd.xlane.f32.xlu1 %v662_v35  ;;  %705 = vadd.xlane.f32.xlu0 %v704_v32  ;;  %v550_v40 = vadd.f32 %v2557_v12, %v549_v36 }
 0x184   :  { %v618_v41 = vmul.f32 %v2713_v37, %v2713_v37 }
 0x185   :  { %2137 = vtanh.f32 %v550_v40 }
 0x186   :  { %v507_v42 = vpop.f32.mrf.mxu1  ;;  %v707_v51 = vsel %vm622_vm2, %v618_v41, 0.0 }
 0x187   :  { %v2718_v45 = vpop.eup %2135  ;;  %v508_v46 = vadd.f32 %v2557_v12, %v507_v42  ;;  %v55_v42 = vld [vmem:[%s3815_s1] sm:$0xff] }
 0x188   :  { %v604_v49 = vmul.f32 %v2718_v45, %v2718_v45 }
 0x189   :  { %2139 = vtanh.f32 %v508_v46 }
 0x18a   :  { %v665_v52 = vsel %vm622_vm2, %v604_v49, 0.0  ;;  %v552_v54 = vpop.f32.mrf.mxu3 }
 0x18b   :  { %v2725_v56 = vpop.eup %2137  ;;  %666 = vadd.xlane.f32.xlu2 %v665_v52  ;;  %708 = vadd.xlane.f32.xlu1 %v707_v51  ;;  %v553_v57 = vadd.f32 %v2557_v12, %v552_v54 }
 0x18c   :  { %3832 = vst [vmem:[#allocation2_spill] sm:$0xff] %v2725_v56  ;;  %v619_v58 = vmul.f32 %v2725_v56, %v2725_v56 }
 0x18d   :  { %2141 = vtanh.f32 %v553_v57 }
 0x18e   :  { %v510_v59 = vpop.f32.mrf.mxu1  ;;  %v625_v62 = vpop.xlane.xlu0 %624  ;;  %v710_v3 = vsel %vm622_vm2, %v619_v58, 0.0 }
 0x18f   :  { %v2730_v63 = vpop.eup %2139  ;;  %v511_v0 = vadd.f32 %v2557_v12, %v510_v59  ;;  %2143 = vrsqrt.f32 %v625_v62  ;;  %vm725_vm4 = vweird.f32 %v625_v62 }
 0x190   :  { %v605_v4 = vmul.f32 %v2730_v63, %v2730_v63 }
 0x191   :  { %2145 = vtanh.f32 %v511_v0 }
 0x192   :  { %v668_v6 = vsel %vm622_vm2, %v605_v4, 0.0  ;;  %v555_v7 = vpop.f32.mrf.mxu3 }
 0x193   :  { %v2737_v8 = vpop.eup %2141  ;;  %711 = vadd.xlane.f32.xlu2 %v710_v3  ;;  %669 = vadd.xlane.f32.xlu0 %v668_v6  ;;  %v556_v10 = vadd.f32 %v2557_v12, %v555_v7 }
 0x194   :  { %v620_v13 = vmul.f32 %v2737_v8, %v2737_v8 }
 0x195   :  { %v2144_v14 = vpop.eup %2143  ;;  %2147 = vtanh.f32 %v556_v10 }
 0x196   :  { %v720_v17 = vmul.f32 %v2144_v14, %v625_v62  ;;  %v628_v47 = vpop.xlane.xlu0 %627  ;;  %v713_v24 = vsel %vm622_vm2, %v620_v13, 0.0  ;;  %vm726_vm3 = vweird.f32 %v2144_v14 }
 0x197   :  { %v2742_v43 = vpop.eup %2145  ;;  %2149 = vrsqrt.f32 %v628_v47  ;;  %vm727_vm5 = vmor %vm725_vm4, %vm726_vm3  ;;  %vm735_vm7 = vweird.f32 %v628_v47 }
 0x198   :  { %v721_v19 = vmul.f32 %v2144_v14, %v720_v17  ;;  %v606_v20 = vmul.f32 %v2742_v43, %v2742_v43 }
 0x19a   :  { %v722_v25 = vmul.f32 0.5, %v721_v19  ;;  %v671_v27 = vsel %vm622_vm2, %v606_v20, 0.0 }
 0x19b   :  { %v2748_v12 = vpop.eup %2147  ;;  %672 = vadd.xlane.f32.xlu1 %v671_v27  ;;  %714 = vadd.xlane.f32.xlu0 %v713_v24 }
 0x19c   :  { %v723_v30 = vsub.f32 1.5, %v722_v25  ;;  %v621_v31 = vmul.f32 %v2748_v12, %v2748_v12 }
 0x19d   :  { %v2150_v36 = vpop.eup %2149 }
 0x19e   :  { %v724_v32 = vmul.f32 %v2144_v14, %v723_v30  ;;  %v631_v35 = vpop.xlane.xlu1 %630  ;;  %v716_v41 = vsel %vm622_vm2, %v621_v31, 0.0  ;;  %v730_v49 = vmul.f32 %v2150_v36, %v628_v47  ;;  %vm736_vm6 = vweird.f32 %v2150_v36  ;;  %v56_v30 = vld [vmem:[%s3815_s1 + $0x8] sm:$0xff] }
 0x19f   :  { %2151 = vrsqrt.f32 %v631_v35  ;;  %vm737_vm9 = vmor %vm735_vm7, %vm736_vm6  ;;  %vm745_vm10 = vweird.f32 %v631_v35 }
 0x1a0   :  { %v728_v40 = vsel %vm727_vm5, %v2144_v14, %v724_v32  ;;  %v731_v58 = vmul.f32 %v2150_v36, %v730_v49 }
 0x1a1   :  { %v2757_v46 = vmul.f32 %v2562_v18, %v728_v40 }
 0x1a2   :  { %v732_v62 = vmul.f32 0.5, %v731_v58 }
 0x1a3   :  { %3833 = vst [vmem:[#allocation3_spill] sm:$0xff] %v2757_v46  ;;  %717 = vadd.xlane.f32.xlu1 %v716_v41  ;;  %v1071_v51 = vmul.f32 %v2757_v46, %v55_v42  ;;  %v676_v41 = vpop.xlane.xlu2 %675 }
 0x1a4   :  { %v733_v3 = vsub.f32 1.5, %v732_v62  ;;  %vm895_vm4 = vweird.f32 %v676_v41 }
 0x1a5   :  { %v2152_v52 = vpop.eup %2151  ;;  %v1103_v54 = vsel %vm622_vm2, %v1071_v51, 0.0  ;;  %v2781_v51 = vld [vmem:[%s3815_s1 + $0x10] sm:$0xff] }
 0x1a6   :  { %v740_v57 = vmul.f32 %v2152_v52, %v631_v35  ;;  %1104 = vadd.xlane.f32.xlu2 %v1103_v54  ;;  %v734_v4 = vmul.f32 %v2150_v36, %v733_v3  ;;  %vm746_vm8 = vweird.f32 %v2152_v52  ;;  %v634_v14 = vpop.xlane.xlu1 %633 }
 0x1a7   :  { %vm747_vm11 = vmor %vm745_vm10, %vm746_vm8  ;;  %2153 = vrsqrt.f32 %v634_v14  ;;  %vm755_vm13 = vweird.f32 %v634_v14 }
 0x1a8   :  { %v741_v59 = vmul.f32 %v2152_v52, %v740_v57  ;;  %v738_v7 = vsel %vm737_vm9, %v2150_v36, %v734_v4  ;;  %v58_v57 = vld [vmem:[%s3815_s1 + $0x18] sm:$0xff] }
 0x1a9   :  { %v2764_v13 = vmul.f32 %v2568_v21, %v738_v7  ;;  %v73_v7 = vld [vmem:[%s3815_s1 + $0x90] sm:$0xff] }
 0x1aa   :  { %v742_v0 = vmul.f32 0.5, %v741_v59  ;;  %v679_v47 = vpop.xlane.xlu0 %678 }
 0x1ab   :  { %2155 = vrsqrt.f32 %v679_v47  ;;  %vm905_vm0 = vweird.f32 %v679_v47 }
 0x1ac   :  { %v743_v18 = vsub.f32 1.5, %v742_v0  ;;  %2157 = vrsqrt.f32 %v676_v41 }
 0x1ad   :  { %v2154_v19 = vpop.eup %2153 }
 0x1ae   :  { %v744_v6 = vmul.f32 %v2152_v52, %v743_v18  ;;  %v750_v20 = vmul.f32 %v2154_v19, %v634_v14  ;;  %vm756_vm12 = vweird.f32 %v2154_v19  ;;  %v637_v59 = vpop.xlane.xlu2 %636 }
 0x1af   :  { %1807 = vrot.lane.b32.xlu0 %v2757_v46, %s2287_s10  ;;  %vm757_vm14 = vmor %vm755_vm13, %vm756_vm12  ;;  %2159 = vrsqrt.f32 %v637_v59  ;;  %vm765_vm7 = vweird.f32 %v637_v59 }
 0x1b0   :  { %v748_v10 = vsel %vm747_vm11, %v2152_v52, %v744_v6  ;;  %v751_v24 = vmul.f32 %v2154_v19, %v750_v20 }
 0x1b1   :  { %v2769_v17 = vmul.f32 %v2575_v28, %v748_v10  ;;  %v2156_v25 = vpop.eup %2155  ;;  %v1072_v28 = vmul.f32 %v2764_v13, %v56_v30 }
 0x1b2   :  { %v752_v27 = vmul.f32 0.5, %v751_v24  ;;  %v900_v21 = vmul.f32 %v2156_v25, %v679_v47  ;;  %vm906_vm15 = vweird.f32 %v2156_v25  ;;  %v2158_v0 = vpop.eup %2157  ;;  %v682_v14 = vpop.xlane.xlu1 %681 }
 0x1b3   :  { %v1106_v40 = vsel %vm622_vm2, %v1072_v28, 0.0  ;;  %v1073_v58 = vmul.f32 %v2769_v17, %v2781_v51  ;;  %vm907_vm1 = vmor %vm905_vm0, %vm906_vm15  ;;  %v890_v18 = vmul.f32 %v2158_v0, %v676_v41  ;;  %2161 = vrsqrt.f32 %v682_v14 }
 0x1b4   :  { %v753_v31 = vsub.f32 1.5, %v752_v27  ;;  %v901_v32 = vmul.f32 %v2156_v25, %v900_v21  ;;  %vm896_vm3 = vweird.f32 %v2158_v0  ;;  %vm915_vm10 = vweird.f32 %v682_v14 }
 0x1b5   :  { %v891_v10 = vmul.f32 %v2158_v0, %v890_v18  ;;  %vm897_vm5 = vmor %vm895_vm4, %vm896_vm3 }
 0x1b6   :  { %v754_v35 = vmul.f32 %v2154_v19, %v753_v31  ;;  %v902_v36 = vmul.f32 0.5, %v901_v32 }
 0x1b7   :  { %v892_v20 = vmul.f32 0.5, %v891_v10 }
 0x1b8   :  { %v758_v42 = vsel %vm757_vm14, %v2154_v19, %v754_v35  ;;  %v903_v49 = vsub.f32 1.5, %v902_v36  ;;  %v2160_v19 = vpop.eup %2159 }
 0x1b9   :  { %v2784_v52 = vmul.f32 %v2587_v38, %v758_v42  ;;  %v1109_v38 = vsel %vm622_vm2, %v1073_v58, 0.0  ;;  %v760_v24 = vmul.f32 %v2160_v19, %v637_v59  ;;  %v2162_v21 = vpop.eup %2161  ;;  %vm766_vm6 = vweird.f32 %v2160_v19 }
 0x1ba   :  { %v904_v54 = vmul.f32 %v2156_v25, %v903_v49  ;;  %v910_v32 = vmul.f32 %v2162_v21, %v682_v14  ;;  %vm767_vm8 = vmor %vm765_vm7, %vm766_vm6  ;;  %vm916_vm9 = vweird.f32 %v2162_v21  ;;  %v2832_v14 = vld [vmem:[%s3815_s1 + $0x98] sm:$0xff] }
 0x1bb   :  { %3834 = vst [vmem:[#allocation4_spill] sm:$0xff] %v2784_v52  ;;  %v1074_v62 = vmul.f32 %v2784_v52, %v58_v57  ;;  %v761_v27 = vmul.f32 %v2160_v19, %v760_v24  ;;  %vm917_vm11 = vmor %vm915_vm10, %vm916_vm9 }
 0x1bc   :  { %1809 = vrot.lane.b32.xlu1 %v2764_v13, %s2287_s10  ;;  %v908_v3 = vsel %vm907_vm1, %v2156_v25, %v904_v54  ;;  %v911_v35 = vmul.f32 %v2162_v21, %v910_v32 }
 0x1bd   :  { %v1112_v4 = vsel %vm622_vm2, %v1074_v62, 0.0  ;;  %v2795_v6 = vmul.f32 %v2593_v44, %v908_v3  ;;  %v893_v44 = vsub.f32 1.5, %v892_v20  ;;  %v762_v31 = vmul.f32 0.5, %v761_v27  ;;  %v2837_v20 = vld [vmem:[%s3815_s1 + $0x88] sm:$0xff] }
 0x1be   :  { %1811 = vrot.lane.b32.xlu2 %v2769_v17, %s2287_s10  ;;  %v912_v49 = vmul.f32 0.5, %v911_v35 }
 0x1bf   :  { %3835 = vst [vmem:[#allocation5_spill] sm:$0xff] %v2795_v6  ;;  %v1089_v47 = vmul.f32 %v2795_v6, %v73_v7  ;;  %v894_v30 = vmul.f32 %v2158_v0, %v893_v44  ;;  %v763_v28 = vsub.f32 1.5, %v762_v31 }
 0x1c0   :  { %v913_v54 = vsub.f32 1.5, %v912_v49 }
 0x1c1   :  { %v1157_v25 = vsel %vm622_vm2, %v1089_v47, 0.0  ;;  %v898_v36 = vsel %vm897_vm5, %v2158_v0, %v894_v30  ;;  %v764_v42 = vmul.f32 %v2160_v19, %v763_v28 }
 0x1c2   :  { %v914_v41 = vmul.f32 %v2162_v21, %v913_v54 }
 0x1c3   :  { %v768_v57 = vsel %vm767_vm8, %v2160_v19, %v764_v42 }
 0x1c4   :  { %v2812_v58 = vmul.f32 %v2599_v50, %v768_v57  ;;  %v918_v62 = vsel %vm917_vm11, %v2162_v21, %v914_v41  ;;  %v2824_v50 = vld [vmem:[%s3815_s1 + $0x20] sm:$0xff]  ;;  %v61_v41 = vld [vmem:[%s3815_s1 + $0x30] sm:$0xff] }
 0x1c5   :  { %v2817_v0 = vmul.f32 %v2605_v55, %v918_v62  ;;  %v640_v55 = vpop.xlane.xlu2 %639 }
 0x1c6   :  { %v1075_v18 = vmul.f32 %v2812_v58, %v2824_v50  ;;  %vm775_vm4 = vweird.f32 %v640_v55 }
 0x1c7   :  { %v1090_v24 = vmul.f32 %v2817_v0, %v2832_v14 }
 0x1c8   :  { %v1115_v10 = vsel %vm622_vm2, %v1075_v18, 0.0 }
 0x1c9   :  { %v1160_v30 = vsel %vm622_vm2, %v1090_v24, 0.0 }
 0x1d9   :  { %1107 = vadd.xlane.f32.xlu0 %v1106_v40  ;;  %v2807_v40 = vmul.f32 %v2581_v33, %v898_v36  ;;  %v643_v33 = vpop.xlane.xlu0 %642 }
 0x1da   :  { %2163 = vrsqrt.f32 %v643_v33  ;;  %vm785_vm13 = vweird.f32 %v643_v33 }
 0x1db   :  { %v1088_v27 = vmul.f32 %v2807_v40, %v2837_v20 }
 0x1dd   :  { %v1154_v28 = vsel %vm622_vm2, %v1088_v27, 0.0 }
 0x1e0   :  { %v2164_v3 = vpop.eup %2163 }
 0x1e1   :  { %v688_v59 = vpop.xlane.xlu0 %687  ;;  %vm786_vm12 = vweird.f32 %v2164_v3 }
 0x1e2   :  { %2165 = vrsqrt.f32 %v688_v59  ;;  %vm787_vm14 = vmor %vm785_vm13, %vm786_vm12  ;;  %vm935_vm0 = vweird.f32 %v688_v59 }
 0x1e3   :  { %2167 = vrsqrt.f32 %v640_v55 }
 0x1e6   :  { %1110 = vadd.xlane.f32.xlu1 %v1109_v38  ;;  %v780_v38 = vmul.f32 %v2164_v3, %v643_v33 }
 0x1e7   :  { %1113 = vadd.xlane.f32.xlu2 %v1112_v4 }
 0x1e8   :  { %v781_v4 = vmul.f32 %v2164_v3, %v780_v38  ;;  %v2166_v7 = vpop.eup %2165  ;;  %v646_v38 = vpop.xlane.xlu1 %645 }
 0x1e9   :  { %v930_v19 = vmul.f32 %v2166_v7, %v688_v59  ;;  %v2168_v21 = vpop.eup %2167  ;;  %vm936_vm15 = vweird.f32 %v2166_v7  ;;  %2169 = vrsqrt.f32 %v646_v38  ;;  %vm795_vm7 = vweird.f32 %v646_v38 }
 0x1ea   :  { %v782_v47 = vmul.f32 0.5, %v781_v4  ;;  %v770_v35 = vmul.f32 %v2168_v21, %v640_v55  ;;  %vm937_vm1 = vmor %vm935_vm0, %vm936_vm15  ;;  %vm776_vm3 = vweird.f32 %v2168_v21 }
 0x1eb   :  { %v931_v44 = vmul.f32 %v2166_v7, %v930_v19  ;;  %vm777_vm5 = vmor %vm775_vm4, %vm776_vm3 }
 0x1ec   :  { %v771_v49 = vmul.f32 %v2168_v21, %v770_v35 }
 0x1ed   :  { %1813 = vrot.lane.b32.xlu0 %v2784_v52, %s2287_s10  ;;  %v932_v32 = vmul.f32 0.5, %v931_v44 }
 0x1ee   :  { %v772_v62 = vmul.f32 0.5, %v771_v49 }
 0x1ef   :  { %1158 = vadd.xlane.f32.xlu2 %v1157_v25  ;;  %v783_v25 = vsub.f32 1.5, %v782_v47  ;;  %v933_v42 = vsub.f32 1.5, %v932_v32  ;;  %v2170_v19 = vpop.eup %2169 }
 0x1f0   :  { %v773_v4 = vsub.f32 1.5, %v772_v62  ;;  %v691_v59 = vpop.xlane.xlu1 %690  ;;  %vm796_vm6 = vweird.f32 %v2170_v19 }
 0x1f1   :  { %v784_v31 = vmul.f32 %v2164_v3, %v783_v25  ;;  %v934_v57 = vmul.f32 %v2166_v7, %v933_v42  ;;  %2171 = vrsqrt.f32 %v691_v59  ;;  %vm797_vm8 = vmor %vm795_vm7, %vm796_vm6  ;;  %vm945_vm10 = vweird.f32 %v691_v59 }
 0x1f2   :  { %v774_v47 = vmul.f32 %v2168_v21, %v773_v4 }
 0x1f3   :  { %v788_v36 = vsel %vm787_vm14, %v2164_v3, %v784_v31  ;;  %v938_v33 = vsel %vm937_vm1, %v2166_v7, %v934_v57  ;;  %v652_v57 = vpop.xlane.xlu0 %651 }
 0x1f4   :  { %v2846_v54 = vmul.f32 %v2622_v5, %v788_v36  ;;  %v2854_v5 = vmul.f32 %v2629_v11, %v938_v33  ;;  %v778_v24 = vsel %vm777_vm5, %v2168_v21, %v774_v47  ;;  %v790_v11 = vmul.f32 %v2170_v19, %v646_v38  ;;  %v2888_v33 = vld [vmem:[%s3815_s1 + $0x38] sm:$0xff] }
 0x1f5   :  { %1843 = vrot.lane.b32.xlu0 %v2795_v6, %s2287_s10  ;;  %v2864_v44 = vmul.f32 %v2611_v60, %v778_v24  ;;  %2173 = vrsqrt.f32 %v652_v57  ;;  %vm815_vm13 = vweird.f32 %v652_v57 }
 0x1f6   :  { %3836 = vst [vmem:[#allocation6_spill] sm:$0xff] %v2846_v54  ;;  %v1077_v18 = vmul.f32 %v2846_v54, %v61_v41  ;;  %v791_v55 = vmul.f32 %v2170_v19, %v790_v11  ;;  %v2899_v11 = vld [vmem:[%s3815_s1 + $0xb0] sm:$0xff] }
 0x1f7   :  { %3837 = vst [vmem:[#allocation7_spill] sm:$0xff] %v2854_v5  ;;  %v2172_v27 = vpop.eup %2171 }
 0x1f8   :  { %v1121_v3 = vsel %vm622_vm2, %v1077_v18, 0.0  ;;  %v940_v31 = vmul.f32 %v2172_v27, %v691_v59  ;;  %vm946_vm9 = vweird.f32 %v2172_v27  ;;  %v685_v18 = vpop.xlane.xlu2 %684 }
 0x1f9   :  { %vm947_vm11 = vmor %vm945_vm10, %vm946_vm9  ;;  %2175 = vrsqrt.f32 %v685_v18  ;;  %vm925_vm0 = vweird.f32 %v685_v18 }
 0x1fa   :  { %v941_v21 = vmul.f32 %v2172_v27, %v940_v31 }
 0x1fb   :  { %v697_v38 = vpop.xlane.xlu0 %696  ;;  %v2174_v4 = vpop.eup %2173 }
 0x1fc   :  { %v942_v35 = vmul.f32 0.5, %v941_v21  ;;  %2177 = vrsqrt.f32 %v697_v38  ;;  %v810_v47 = vmul.f32 %v2174_v4, %v652_v57  ;;  %vm816_vm12 = vweird.f32 %v2174_v4 }
 0x1fd   :  { %vm817_vm15 = vmor %vm815_vm13, %vm816_vm12  ;;  %vm965_vm4 = vweird.f32 %v697_v38 }
 0x1fe   :  { %v943_v36 = vsub.f32 1.5, %v942_v35  ;;  %v811_v24 = vmul.f32 %v2174_v4, %v810_v47 }
 0x1ff   :  { %1841 = vrot.lane.b32.xlu1 %v2807_v40, %s2287_s10 }
 0x200   :  { %v944_v49 = vmul.f32 %v2172_v27, %v943_v36 }
 0x202   :  { %v948_v41 = vsel %vm947_vm11, %v2172_v27, %v944_v49 }
 0x203   :  { %v2876_v62 = vmul.f32 %v2641_v22, %v948_v41 }
 0x205   :  { %v1093_v27 = vmul.f32 %v2876_v62, %v2899_v11 }
 0x207   :  { %1815 = vrot.lane.b32.xlu2 %v2812_v58, %s2287_s10  ;;  %v1169_v21 = vsel %vm622_vm2, %v1093_v27, 0.0 }
 0x20f   :  { %1845 = vrot.lane.b32.xlu2 %v2817_v0, %s2287_s10 }
 0x21f   :  { %1116 = vadd.xlane.f32.xlu0 %v1115_v10  ;;  %v76_v10 = vld [vmem:[%s3815_s1 + $0xa8] sm:$0xff] }
 0x220   :  { %v1092_v7 = vmul.f32 %v2854_v5, %v76_v10  ;;  %v2176_v10 = vpop.eup %2175 }
 0x221   :  { %vm926_vm14 = vweird.f32 %v2176_v10 }
 0x222   :  { %v1166_v25 = vsel %vm622_vm2, %v1092_v7, 0.0  ;;  %v920_v7 = vmul.f32 %v2176_v10, %v685_v18  ;;  %vm927_vm1 = vmor %vm925_vm0, %vm926_vm14 }
 0x227   :  { %1161 = vadd.xlane.f32.xlu0 %v1160_v30  ;;  %v792_v30 = vmul.f32 0.5, %v791_v55  ;;  %v921_v55 = vmul.f32 %v2176_v10, %v920_v7 }
 0x229   :  { %1155 = vadd.xlane.f32.xlu1 %v1154_v28  ;;  %v793_v32 = vsub.f32 1.5, %v792_v30  ;;  %v812_v30 = vmul.f32 0.5, %v811_v24  ;;  %v655_v24 = vpop.xlane.xlu1 %654 }
 0x22a   :  { %2179 = vrsqrt.f32 %v655_v24  ;;  %vm825_vm7 = vweird.f32 %v655_v24 }
 0x22b   :  { %v794_v28 = vmul.f32 %v2170_v19, %v793_v32  ;;  %v922_v32 = vmul.f32 0.5, %v921_v55 }
 0x22d   :  { %v798_v60 = vsel %vm797_vm8, %v2170_v19, %v794_v28  ;;  %v813_v28 = vsub.f32 1.5, %v812_v30  ;;  %v923_v36 = vsub.f32 1.5, %v922_v32 }
 0x22e   :  { %v2871_v42 = vmul.f32 %v2634_v16, %v798_v60  ;;  %v2883_v16 = vld [vmem:[%s3815_s1 + $0x28] sm:$0xff] }
 0x22f   :  { %v1076_v22 = vmul.f32 %v2864_v44, %v2883_v16  ;;  %v814_v60 = vmul.f32 %v2174_v4, %v813_v28  ;;  %v924_v41 = vmul.f32 %v2176_v10, %v923_v36 }
 0x231   :  { %v1118_v59 = vsel %vm622_vm2, %v1076_v22, 0.0  ;;  %v928_v47 = vsel %vm927_vm1, %v2176_v10, %v924_v41 }
 0x232   :  { %v2911_v57 = vmul.f32 %v2617_v1, %v928_v47  ;;  %v79_v1 = vld [vmem:[%s3815_s1 + $0xc0] sm:$0xff] }
 0x233   :  { %v2935_v47 = vld [vmem:[%s3815_s1 + $0xa0] sm:$0xff] }
 0x238   :  { %1122 = vadd.xlane.f32.xlu2 %v1121_v3  ;;  %v1078_v3 = vmul.f32 %v2871_v42, %v2888_v33 }
 0x23a   :  { %v1124_v19 = vsel %vm622_vm2, %v1078_v3, 0.0  ;;  %v818_v3 = vsel %vm817_vm15, %v2174_v4, %v814_v60 }
 0x23b   :  { %1819 = vrot.lane.b32.xlu0 %v2846_v54, %s2287_s10 }
 0x240   :  { %1167 = vadd.xlane.f32.xlu2 %v1166_v25  ;;  %v2178_v25 = vpop.eup %2177 }
 0x241   :  { %v960_v31 = vmul.f32 %v2178_v25, %v697_v38  ;;  %vm966_vm3 = vweird.f32 %v2178_v25  ;;  %v700_v38 = vpop.xlane.xlu1 %699  ;;  %v2180_v27 = vpop.eup %2179 }
 0x242   :  { %1817 = vrot.lane.b32.xlu1 %v2864_v44, %s2287_s10  ;;  %vm967_vm5 = vmor %vm965_vm4, %vm966_vm3  ;;  %2181 = vrsqrt.f32 %v700_v38  ;;  %vm826_vm6 = vweird.f32 %v2180_v27  ;;  %vm975_vm10 = vweird.f32 %v700_v38 }
 0x243   :  { %1849 = vrot.lane.b32.xlu0 %v2854_v5, %s2287_s10  ;;  %v961_v35 = vmul.f32 %v2178_v25, %v960_v31  ;;  %vm827_vm8 = vmor %vm825_vm7, %vm826_vm6 }
 0x245   :  { %v962_v49 = vmul.f32 0.5, %v961_v35 }
 0x247   :  { %v963_v22 = vsub.f32 1.5, %v962_v49  ;;  %v649_v49 = vpop.xlane.xlu2 %648 }
 0x248   :  { %v2182_v31 = vpop.eup %2181  ;;  %2183 = vrsqrt.f32 %v649_v49  ;;  %vm805_vm13 = vweird.f32 %v649_v49 }
 0x249   :  { %v964_v7 = vmul.f32 %v2178_v25, %v963_v22  ;;  %vm976_vm9 = vweird.f32 %v2182_v31 }
 0x24a   :  { %vm977_vm11 = vmor %vm975_vm10, %vm976_vm9 }
 0x24b   :  { %v968_v18 = vsel %vm967_vm5, %v2178_v25, %v964_v7  ;;  %v820_v25 = vmul.f32 %v2180_v27, %v655_v24 }
 0x24c   :  { %v2918_v10 = vmul.f32 %v2665_v48, %v968_v18 }
 0x24d   :  { %v821_v48 = vmul.f32 %v2180_v27, %v820_v25 }
 0x24e   :  { %3839 = vst [vmem:[#allocation9_spill] sm:$0xff] %v2918_v10  ;;  %v1095_v55 = vmul.f32 %v2918_v10, %v79_v1  ;;  %v2184_v24 = vpop.eup %2183 }
 0x24f   :  { %v822_v32 = vmul.f32 0.5, %v821_v48  ;;  %vm806_vm12 = vweird.f32 %v2184_v24 }
 0x250   :  { %v1175_v30 = vsel %vm622_vm2, %v1095_v55, 0.0  ;;  %vm807_vm14 = vmor %vm805_vm13, %vm806_vm12 }
 0x251   :  { %v823_v28 = vsub.f32 1.5, %v822_v32 }
 0x253   :  { %v824_v36 = vmul.f32 %v2180_v27, %v823_v28 }
 0x255   :  { %v828_v22 = vsel %vm827_vm8, %v2180_v27, %v824_v36 }
 0x258   :  { %1821 = vrot.lane.b32.xlu2 %v2871_v42, %s2287_s10 }
 0x260   :  { %1851 = vrot.lane.b32.xlu2 %v2876_v62, %s2287_s10 }
 0x26c   :  { %1119 = vadd.xlane.f32.xlu1 %v1118_v59  ;;  %v2905_v59 = vmul.f32 %v2658_v39, %v818_v3  ;;  %v2930_v3 = vmul.f32 %v2670_v53, %v828_v22 }
 0x26d   :  { %1125 = vadd.xlane.f32.xlu0 %v1124_v19  ;;  %v64_v19 = vld [vmem:[%s3815_s1 + $0x48] sm:$0xff] }
 0x26e   :  { %3838 = vst [vmem:[#allocation8_spill] sm:$0xff] %v2905_v59  ;;  %v1080_v4 = vmul.f32 %v2905_v59, %v64_v19  ;;  %v1091_v19 = vmul.f32 %v2911_v57, %v2935_v47 }
 0x270   :  { %v1130_v39 = vsel %vm622_vm2, %v1080_v4, 0.0  ;;  %v661_v4 = vpop.xlane.xlu0 %660  ;;  %v1163_v53 = vsel %vm622_vm2, %v1091_v19, 0.0 }
 0x271   :  { %2185 = vrsqrt.f32 %v661_v4  ;;  %vm845_vm0 = vweird.f32 %v661_v4 }
 0x275   :  { %1170 = vadd.xlane.f32.xlu0 %v1169_v21  ;;  %v970_v21 = vmul.f32 %v2182_v31, %v700_v38  ;;  %v2950_v38 = vld [vmem:[%s3815_s1 + $0x50] sm:$0xff] }
 0x276   :  { %v1081_v25 = vmul.f32 %v2930_v3, %v2950_v38 }
 0x277   :  { %v971_v35 = vmul.f32 %v2182_v31, %v970_v21  ;;  %v2958_v21 = vld [vmem:[%s3815_s1 + $0xc8] sm:$0xff] }
 0x278   :  { %v706_v27 = vpop.xlane.xlu0 %705 }
 0x279   :  { %v972_v60 = vmul.f32 0.5, %v971_v35  ;;  %2187 = vrsqrt.f32 %v706_v27  ;;  %vm995_vm4 = vweird.f32 %v706_v27 }
 0x27b   :  { %v973_v41 = vsub.f32 1.5, %v972_v60 }
 0x27d   :  { %v974_v7 = vmul.f32 %v2182_v31, %v973_v41 }
 0x27f   :  { %v978_v18 = vsel %vm977_vm11, %v2182_v31, %v974_v7 }
 0x280   :  { %v2943_v1 = vmul.f32 %v2677_v61, %v978_v18  ;;  %v1133_v61 = vsel %vm622_vm2, %v1081_v25, 0.0 }
 0x282   :  { %v1096_v35 = vmul.f32 %v2943_v1, %v2958_v21 }
 0x284   :  { %v1178_v7 = vsel %vm622_vm2, %v1096_v35, 0.0 }
 0x285   :  { %1847 = vrot.lane.b32.xlu1 %v2911_v57, %s2287_s10 }
 0x289   :  { %1825 = vrot.lane.b32.xlu0 %v2905_v59, %s2287_s10  ;;  %1131 = vadd.xlane.f32.xlu2 %v1130_v39  ;;  %v800_v39 = vmul.f32 %v2184_v24, %v649_v49 }
 0x28b   :  { %v801_v55 = vmul.f32 %v2184_v24, %v800_v39 }
 0x28d   :  { %v802_v48 = vmul.f32 0.5, %v801_v55 }
 0x28f   :  { %v803_v32 = vsub.f32 1.5, %v802_v48 }
 0x291   :  { %1855 = vrot.lane.b32.xlu0 %v2918_v10, %s2287_s10  ;;  %1176 = vadd.xlane.f32.xlu2 %v1175_v30  ;;  %v2186_v30 = vpop.eup %2185  ;;  %v804_v60 = vmul.f32 %v2184_v24, %v803_v32 }
 0x292   :  { %v840_v31 = vmul.f32 %v2186_v30, %v661_v4  ;;  %v2188_v36 = vpop.eup %2187  ;;  %vm846_vm15 = vweird.f32 %v2186_v30 }
 0x293   :  { %v990_v22 = vmul.f32 %v2188_v36, %v706_v27  ;;  %v808_v19 = vsel %vm807_vm14, %v2184_v24, %v804_v60  ;;  %vm847_vm1 = vmor %vm845_vm0, %vm846_vm15  ;;  %vm996_vm3 = vweird.f32 %v2188_v36  ;;  %v664_v24 = vpop.xlane.xlu1 %663 }
 0x294   :  { %v841_v28 = vmul.f32 %v2186_v30, %v840_v31  ;;  %v2964_v39 = vmul.f32 %v2646_v26, %v808_v19  ;;  %v67_v26 = vld [vmem:[%s3815_s1 + $0x60] sm:$0xff]  ;;  %vm997_vm5 = vmor %vm995_vm4, %vm996_vm3  ;;  %2189 = vrsqrt.f32 %v664_v24  ;;  %vm855_vm7 = vweird.f32 %v664_v24 }
 0x296   :  { %v842_v41 = vmul.f32 0.5, %v841_v28 }
 0x298   :  { %v843_v18 = vsub.f32 1.5, %v842_v41 }
 0x29a   :  { %v844_v55 = vmul.f32 %v2186_v30, %v843_v18  ;;  %v2190_v60 = vpop.eup %2189 }
 0x29b   :  { %v709_v35 = vpop.xlane.xlu1 %708  ;;  %vm856_vm6 = vweird.f32 %v2190_v60 }
 0x29c   :  { %v848_v48 = vsel %vm847_vm1, %v2186_v30, %v844_v55  ;;  %v82_v30 = vld [vmem:[%s3815_s1 + $0xd8] sm:$0xff]  ;;  %2191 = vrsqrt.f32 %v709_v35  ;;  %vm857_vm8 = vmor %vm855_vm7, %vm856_vm6  ;;  %vm1005_vm10 = vweird.f32 %v709_v35 }
 0x29d   :  { %v2969_v31 = vmul.f32 %v2694_v15, %v848_v48 }
 0x29f   :  { %3840 = vst [vmem:[#allocation10_spill] sm:$0xff] %v2969_v31  ;;  %v1083_v32 = vmul.f32 %v2969_v31, %v67_v26 }
 0x2a1   :  { %v1139_v4 = vsel %vm622_vm2, %v1083_v32, 0.0 }
 0x2a9   :  { %1827 = vrot.lane.b32.xlu2 %v2930_v3, %s2287_s10 }
 0x2af   :  { %1164 = vadd.xlane.f32.xlu1 %v1163_v53  ;;  %v991_v53 = vmul.f32 %v2188_v36, %v990_v22 }
 0x2b1   :  { %1857 = vrot.lane.b32.xlu2 %v2943_v1, %s2287_s10  ;;  %v992_v25 = vmul.f32 0.5, %v991_v53  ;;  %v2991_v53 = vld [vmem:[%s3815_s1 + $0x40] sm:$0xff] }
 0x2b3   :  { %v993_v49 = vsub.f32 1.5, %v992_v25 }
 0x2bb   :  { %1134 = vadd.xlane.f32.xlu0 %v1133_v61  ;;  %v994_v61 = vmul.f32 %v2188_v36, %v993_v49  ;;  %v1079_v49 = vmul.f32 %v2964_v39, %v2991_v53 }
 0x2bd   :  { %v998_v28 = vsel %vm997_vm5, %v2188_v36, %v994_v61  ;;  %v850_v36 = vmul.f32 %v2190_v60, %v664_v24  ;;  %v1127_v32 = vsel %vm622_vm2, %v1079_v49, 0.0 }
 0x2be   :  { %v2979_v15 = vmul.f32 %v2701_v23, %v998_v28  ;;  %v2192_v23 = vpop.eup %2191 }
 0x2bf   :  { %v851_v22 = vmul.f32 %v2190_v60, %v850_v36  ;;  %v1000_v18 = vmul.f32 %v2192_v23, %v709_v35  ;;  %v670_v36 = vpop.xlane.xlu0 %669  ;;  %vm1006_vm9 = vweird.f32 %v2192_v23 }
 0x2c0   :  { %3841 = vst [vmem:[#allocation11_spill] sm:$0xff] %v2979_v15  ;;  %v1098_v27 = vmul.f32 %v2979_v15, %v82_v30  ;;  %vm1007_vm11 = vmor %vm1005_vm10, %vm1006_vm9  ;;  %vm875_vm0 = vweird.f32 %v670_v36 }
 0x2c1   :  { %v852_v19 = vmul.f32 0.5, %v851_v22  ;;  %v1001_v25 = vmul.f32 %v2192_v23, %v1000_v18 }
 0x2c2   :  { %v1184_v41 = vsel %vm622_vm2, %v1098_v27, 0.0 }
 0x2c3   :  { %1179 = vadd.xlane.f32.xlu0 %v1178_v7  ;;  %v694_v7 = vpop.xlane.xlu2 %693  ;;  %v853_v55 = vsub.f32 1.5, %v852_v19  ;;  %v1002_v26 = vmul.f32 0.5, %v1001_v25 }
 0x2c4   :  { %2193 = vrsqrt.f32 %v694_v7  ;;  %vm955_vm13 = vweird.f32 %v694_v7 }
 0x2c5   :  { %v854_v61 = vmul.f32 %v2190_v60, %v853_v55  ;;  %2195 = vrsqrt.f32 %v670_v36 }
 0x2c7   :  { %v858_v30 = vsel %vm857_vm8, %v2190_v60, %v854_v61  ;;  %v715_v25 = vpop.xlane.xlu0 %714 }
 0x2c8   :  { %1823 = vrot.lane.b32.xlu1 %v2964_v39, %s2287_s10  ;;  %2197 = vrsqrt.f32 %v715_v25  ;;  %vm1025_vm4 = vweird.f32 %v715_v25 }
 0x2ca   :  { %v2194_v48 = vpop.eup %2193 }
 0x2cb   :  { %v950_v28 = vmul.f32 %v2194_v48, %v694_v7  ;;  %v3001_v18 = vpop.xlane.xlu2 %657  ;;  %vm956_vm12 = vweird.f32 %v2194_v48  ;;  %v3026_v7 = vld [vmem:[%s3815_s1 + $0xe0] sm:$0xff] }
 0x2cc   :  { %vm957_vm14 = vmor %vm955_vm13, %vm956_vm12  ;;  %vm835_vm10 = vweird.f32 %v3001_v18 }
 0x2cd   :  { %v951_v27 = vmul.f32 %v2194_v48, %v950_v28 }
 0x2cf   :  { %v952_v19 = vmul.f32 0.5, %v951_v27 }
 0x2d1   :  { %v953_v24 = vsub.f32 1.5, %v952_v19 }
 0x2d3   :  { %v954_v49 = vmul.f32 %v2194_v48, %v953_v24  ;;  %v3015_v61 = vpop.xlane.xlu2 %702 }
 0x2d7   :  { %1831 = vrot.lane.b32.xlu0 %v2969_v31, %s2287_s10 }
 0x2da   :  { %1140 = vadd.xlane.f32.xlu2 %v1139_v4  ;;  %v1003_v4 = vsub.f32 1.5, %v1002_v26  ;;  %v3017_v26 = vpop.permute.xlu0 %1807 }
 0x2db   :  { %3842 = vst [vmem:[#allocation12_spill] sm:$0xff] %v3017_v26 }
 0x2dc   :  { %v1004_v22 = vmul.f32 %v2192_v23, %v1003_v4 }
 0x2de   :  { %v1008_v55 = vsel %vm1007_vm11, %v2192_v23, %v1004_v22  ;;  %v958_v23 = vsel %vm957_vm14, %v2194_v48, %v954_v49 }
 0x2df   :  { %1861 = vrot.lane.b32.xlu0 %v2979_v15, %s2287_s10  ;;  %v3004_v60 = vmul.f32 %v2713_v37, %v1008_v55  ;;  %v2196_v37 = vpop.eup %2195  ;;  %v3021_v28 = vmul.f32 %v2653_v34, %v958_v23  ;;  %v3037_v55 = vpop.xlane.xlu1 %672 }
 0x2e0   :  { %v870_v4 = vmul.f32 %v2196_v37, %v670_v36  ;;  %v2198_v22 = vpop.eup %2197  ;;  %vm876_vm15 = vweird.f32 %v2196_v37  ;;  %2199 = vrsqrt.f32 %v3037_v55  ;;  %vm885_vm7 = vweird.f32 %v3037_v55 }
 0x2e1   :  { %v1099_v48 = vmul.f32 %v3004_v60, %v3026_v7  ;;  %v1020_v49 = vmul.f32 %v2198_v22, %v715_v25  ;;  %vm877_vm1 = vmor %vm875_vm0, %vm876_vm15  ;;  %vm1026_vm3 = vweird.f32 %v2198_v22  ;;  %v85_v25 = vld [vmem:[%s3815_s1 + $0xf0] sm:$0xff]  ;;  %2201 = vrsqrt.f32 %v3001_v18 }
 0x2e2   :  { %1185 = vadd.xlane.f32.xlu2 %v1184_v41  ;;  %v2997_v41 = vmul.f32 %v2706_v29, %v858_v30  ;;  %v3009_v29 = vld [vmem:[%s3815_s1 + $0x68] sm:$0xff]  ;;  %v3032_v30 = vpop.xlane.xlu2 %666  ;;  %v871_v27 = vmul.f32 %v2196_v37, %v870_v4  ;;  %v3034_v19 = vpop.xlane.xlu0 %1107  ;;  %vm1027_vm5 = vmor %vm1025_vm4, %vm1026_vm3  ;;  %vm985_vm0 = vweird.f32 %v3015_v61 }
 0x2e3   :  { %v1187_v34 = vsel %vm622_vm2, %v1099_v48, 0.0  ;;  %v1021_v23 = vmul.f32 %v2198_v22, %v1020_v49  ;;  %vm865_vm4 = vweird.f32 %v3032_v30 }
 0x2e4   :  { %v1084_v35 = vmul.f32 %v2997_v41, %v3009_v29  ;;  %v872_v24 = vmul.f32 0.5, %v871_v27 }
 0x2e5   :  { %v1022_v31 = vmul.f32 0.5, %v1021_v23 }
 0x2e7   :  { %v3043_v4 = vpop.xlane.xlu1 %717  ;;  %v1023_v10 = vsub.f32 1.5, %v1022_v31 }
 0x2e8   :  { %2203 = vrsqrt.f32 %v3043_v4  ;;  %vm1035_vm13 = vweird.f32 %v3043_v4 }
 0x2e9   :  { %2205 = vrsqrt.f32 %v3015_v61 }
 0x2ea   :  { %v3041_v26 = vpop.xlane.xlu2 %711  ;;  %2207 = vrsqrt.f32 %v3032_v30 }
 0x2ef   :  { %v3052_v49 = vpop.permute.xlu1 %1809 }
 0x2f0   :  { %3847 = vst [vmem:[#allocation17_spill] sm:$0xff] %v3052_v49 }
 0x2f2   :  { %1128 = vadd.xlane.f32.xlu1 %v1127_v32  ;;  %v1142_v32 = vsel %vm622_vm2, %v1084_v35, 0.0  ;;  %v873_v35 = vsub.f32 1.5, %v872_v24  ;;  %v3045_v59 = vpop.xlane.xlu2 %1104  ;;  %v1024_v24 = vmul.f32 %v2198_v22, %v1023_v10 }
 0x2f3   :  { %3844 = vst [vmem:[#allocation14_spill] sm:$0xff] %v3045_v59 }
 0x2f4   :  { %v874_v15 = vmul.f32 %v2196_v37, %v873_v35  ;;  %v70_v35 = vld [vmem:[%s3815_s1 + $0x78] sm:$0xff] }
 0x2f6   :  { %v878_v48 = vsel %vm877_vm1, %v2196_v37, %v874_v15  ;;  %v1028_v15 = vsel %vm1027_vm5, %v2198_v22, %v1024_v24  ;;  %v3076_v22 = vld [vmem:[%s3815_s1 + $0xb8] sm:$0xff] }
 0x2f7   :  { %v3050_v27 = vmul.f32 %v2730_v63, %v878_v48  ;;  %v3065_v36 = vmul.f32 %v2737_v8, %v1028_v15  ;;  %v1111_v23 = vpop.xlane.xlu1 %1110  ;;  %v2200_v48 = vpop.eup %2199 }
 0x2f8   :  { %v880_v24 = vmul.f32 %v2200_v48, %v3037_v55  ;;  %vm886_vm6 = vweird.f32 %v2200_v48 }
 0x2f9   :  { %3846 = vst [vmem:[#allocation16_spill] sm:$0xff] %v3050_v27  ;;  %v1086_v31 = vmul.f32 %v3050_v27, %v70_v35  ;;  %v1101_v8 = vmul.f32 %v3065_v36, %v85_v25  ;;  %v1094_v35 = vmul.f32 %v3021_v28, %v3076_v22  ;;  %vm887_vm8 = vmor %vm885_vm7, %vm886_vm6 }
 0x2fa   :  { %1833 = vrot.lane.b32.xlu2 %v2997_v41, %s2287_s10  ;;  %3848 = vst [vmem:[#allocation18_spill] sm:$0xff] %v3065_v36  ;;  %v3067_v37 = vpop.permute.xlu2 %1811 }
 0x2fb   :  { %v1148_v10 = vsel %vm622_vm2, %v1086_v31, 0.0  ;;  %v2202_v31 = vpop.eup %2201  ;;  %v1193_v15 = vsel %vm622_vm2, %v1101_v8, 0.0  ;;  %v1172_v54 = vsel %vm622_vm2, %v1094_v35, 0.0 }
 0x2fc   :  { %v830_v25 = vmul.f32 %v2202_v31, %v3001_v18  ;;  %vm836_vm9 = vweird.f32 %v2202_v31 }
 0x2fd   :  { %vm837_vm12 = vmor %vm835_vm10, %vm836_vm9  ;;  %vm1935_vm9 = vcmask 48128   ;;  %vm1968_vm10 = vcmask 64512  }
 0x2fe   :  { %v831_v52 = vmul.f32 %v2202_v31, %v830_v25 }
 0x302   :  { %1863 = vrot.lane.b32.xlu2 %v3004_v60, %s2287_s10 }
 0x309   :  { %1143 = vadd.xlane.f32.xlu0 %v1142_v32  ;;  %v3039_v32 = vpop.permute.xlu0 %1813 }
 0x30a   :  { %3843 = vst [vmem:[#allocation13_spill] sm:$0xff] %v3039_v32  ;;  %v3086_v32 = vpop.permute.xlu1 %1841 }
 0x30b   :  { %1853 = vrot.lane.b32.xlu1 %v3021_v28, %s2287_s10  ;;  %3850 = vst [vmem:[#allocation20_spill] sm:$0xff] %v3086_v32 }
 0x311   :  { %1188 = vadd.xlane.f32.xlu0 %v1187_v34  ;;  %v3047_v34 = vpop.permute.xlu0 %1843 }
 0x312   :  { %3845 = vst [vmem:[#allocation15_spill] sm:$0xff] %v3047_v34  ;;  %v3084_v34 = vpop.xlane.xlu2 %1113 }
 0x313   :  { %3849 = vst [vmem:[#allocation19_spill] sm:$0xff] %v3084_v34  ;;  %v832_v34 = vmul.f32 0.5, %v831_v52 }
 0x315   :  { %v833_v32 = vsub.f32 1.5, %v832_v34 }
 0x317   :  { %v834_v25 = vmul.f32 %v2202_v31, %v833_v32 }
 0x319   :  { %v3061_v63 = vpop.xlane.xlu0 %1116  ;;  %v838_v55 = vsel %vm837_vm12, %v2202_v31, %v834_v25 }
 0x31a   :  { %v3095_v56 = vpop.xlane.xlu2 %1158  ;;  %v3119_v18 = vmul.f32 %v2682_v2, %v838_v55 }
 0x321   :  { %v3088_v5 = vpop.xlane.xlu0 %1161 }
 0x322   :  { %v3106_v52 = vpop.permute.xlu2 %1815 }
 0x325   :  { %1837 = vrot.lane.b32.xlu0 %v3050_v27, %s2287_s10  ;;  %v2204_v27 = vpop.eup %2203 }
 0x326   :  { %v1030_v6 = vmul.f32 %v2204_v27, %v3043_v4  ;;  %vm1036_vm11 = vweird.f32 %v2204_v27 }
 0x327   :  { %vm1037_vm14 = vmor %vm1035_vm13, %vm1036_vm11 }
 0x328   :  { %v1031_v8 = vmul.f32 %v2204_v27, %v1030_v6 }
 0x329   :  { %v3093_v49 = vpop.permute.xlu0 %1819 }
 0x32a   :  { %3851 = vst [vmem:[#allocation21_spill] sm:$0xff] %v3093_v49  ;;  %v1032_v59 = vmul.f32 0.5, %v1031_v8 }
 0x32b   :  { %1149 = vadd.xlane.f32.xlu2 %v1148_v10  ;;  %v881_v10 = vmul.f32 %v2200_v48, %v880_v24  ;;  %v1156_v24 = vpop.xlane.xlu1 %1155 }
 0x32d   :  { %v882_v36 = vmul.f32 0.5, %v881_v10 }
 0x32f   :  { %v883_v46 = vsub.f32 1.5, %v882_v36 }
 0x331   :  { %v3100_v6 = vpop.permute.xlu0 %1849 }
 0x332   :  { %3852 = vst [vmem:[#allocation22_spill] sm:$0xff] %v3100_v6 }
 0x333   :  { %1194 = vadd.xlane.f32.xlu2 %v1193_v15  ;;  %v884_v15 = vmul.f32 %v2200_v48, %v883_v46  ;;  %v3098_v35 = vpop.permute.xlu1 %1817 }
 0x335   :  { %1173 = vadd.xlane.f32.xlu1 %v1172_v54  ;;  %v1033_v54 = vsub.f32 1.5, %v1032_v59  ;;  %v888_v10 = vsel %vm887_vm8, %v2200_v48, %v884_v15  ;;  %v3111_v59 = vld [vmem:[%s3815_s1 + $0x80] sm:$0xff]  ;;  %v1201_v48 = vmul.f32 2.0, %v1111_v23  ;;  %v3134_v15 = vpop.permute.xlu2 %1845 }
 0x336   :  { %v3103_v36 = vmul.f32 %v2742_v43, %v888_v10  ;;  %v1216_v10 = vmul.f32 2.0, %v1156_v24 }
 0x337   :  { %v1034_v46 = vmul.f32 %v2204_v27, %v1033_v54  ;;  %v1233_v2 = vmul.f32 %v1201_v48, %v2769_v17 }
 0x338   :  { %v1087_v43 = vmul.f32 %v3103_v36, %v3111_v59 }
 0x339   :  { %v1038_v32 = vsel %vm1037_vm14, %v2204_v27, %v1034_v46  ;;  %v3121_v8 = vpop.xlane.xlu0 %1125  ;;  %v3132_v27 = vld [vmem:[%s3815_s1 + $0xf8] sm:$0xff] }
 0x33a   :  { %v1151_v4 = vsel %vm622_vm2, %v1087_v43, 0.0  ;;  %v3127_v31 = vmul.f32 %v2748_v12, %v1038_v32  ;;  %v3143_v12 = vsub.f32 %v1233_v2, %v2781_v51  ;;  %v1248_v43 = vmul.f32 %v1216_v10, %v2807_v40 }
 0x33b   :  { %v1120_v34 = vpop.xlane.xlu1 %1119  ;;  %v1200_v40 = vmul.f32 2.0, %v3034_v19 }
 0x33c   :  { %v1102_v23 = vmul.f32 %v3127_v31, %v3132_v27  ;;  %v1297_v17 = vmul.f32 %v3143_v12, %v3143_v12  ;;  %v1204_v48 = vmul.f32 2.0, %v1120_v34  ;;  %v3154_v24 = vsub.f32 %v1248_v43, %v2837_v20 }
 0x33d   :  { %v3147_v55 = vpop.xlane.xlu2 %1122  ;;  %v1232_v43 = vmul.f32 %v1200_v40, %v2764_v13 }
 0x33e   :  { %v1196_v25 = vsel %vm622_vm2, %v1102_v23, 0.0  ;;  %v1236_v2 = vmul.f32 %v1204_v48, %v2864_v44  ;;  %v1312_v23 = vmul.f32 %v3154_v24, %v3154_v24  ;;  %v1203_v48 = vmul.f32 2.0, %v3061_v63 }
 0x340   :  { %v3168_v20 = vsub.f32 %v1236_v2, %v2883_v16 }
 0x341   :  { %v3145_v46 = vpop.xlane.xlu0 %1170 }
 0x342   :  { %v1300_v19 = vmul.f32 %v3168_v20, %v3168_v20 }
 0x343   :  { %v3139_v54 = vpop.permute.xlu1 %1847 }
 0x344   :  { %v1342_v2 = vsel %vm622_vm2, %v1300_v19, 0.0 }
 0x345   :  { %v3162_v10 = vpop.xlane.xlu2 %1167 }
 0x349   :  { %v3156_v51 = vpop.permute.xlu0 %1825 }
 0x34a   :  { %3853 = vst [vmem:[#allocation23_spill] sm:$0xff] %v3156_v51 }
 0x34b   :  { %1839 = vrot.lane.b32.xlu2 %v3103_v36, %s2287_s10  ;;  %v1165_v32 = vpop.xlane.xlu1 %1164 }
 0x34c   :  { %v1219_v34 = vmul.f32 2.0, %v1165_v32  ;;  %v2275_v32 = vld [vmem:[%s3815_s1 + $0x8] sm:$0xff] }
 0x34d   :  { %v3182_v16 = vpop.permute.xlu2 %1821 }
 0x34e   :  { %1829 = vrot.lane.b32.xlu1 %v3119_v18, %s2287_s10  ;;  %v1251_v44 = vmul.f32 %v1219_v34, %v2911_v57  ;;  %v1235_v57 = vmul.f32 %v1203_v48, %v2812_v58  ;;  %v3195_v34 = vld [vmem:[%s3815_s1 + $0x58] sm:$0xff]  ;;  %v2206_v48 = vpop.eup %2205 }
 0x34f   :  { %1152 = vadd.xlane.f32.xlu0 %v1151_v4  ;;  %v1333_v4 = vsel %vm622_vm2, %v1297_v17, 0.0  ;;  %v1378_v17 = vsel %vm622_vm2, %v1312_v23, 0.0  ;;  %v3180_v23 = vsub.f32 %v1232_v43, %v2275_v32  ;;  %v1218_v43 = vmul.f32 2.0, %v3088_v5 }
 0x350   :  { %v3186_v40 = vsub.f32 %v1251_v44, %v2935_v47  ;;  %v1082_v58 = vmul.f32 %v3119_v18, %v3195_v34  ;;  %v3205_v19 = vsub.f32 %v1235_v57, %v2824_v50  ;;  %v980_v50 = vmul.f32 %v2206_v48, %v3015_v61 }
 0x351   :  { %v1296_v63 = vmul.f32 %v3180_v23, %v3180_v23  ;;  %vm986_vm15 = vweird.f32 %v2206_v48 }
 0x352   :  { %v1315_v47 = vmul.f32 %v3186_v40, %v3186_v40  ;;  %v1136_v5 = vsel %vm622_vm2, %v1082_v58, 0.0  ;;  %vm987_vm1 = vmor %vm985_vm0, %vm986_vm15 }
 0x353   :  { %v1330_v44 = vsel %vm622_vm2, %v1296_v63, 0.0  ;;  %v1299_v63 = vmul.f32 %v3205_v19, %v3205_v19 }
 0x354   :  { %v1387_v32 = vsel %vm622_vm2, %v1315_v47, 0.0  ;;  %v1206_v47 = vmul.f32 2.0, %v3121_v8  ;;  %v1221_v8 = vmul.f32 2.0, %v3145_v46 }
 0x356   :  { %v1238_v58 = vmul.f32 %v1206_v47, %v2871_v42  ;;  %v1253_v42 = vmul.f32 %v1221_v8, %v2876_v62 }
 0x357   :  { %1197 = vadd.xlane.f32.xlu0 %v1196_v25  ;;  %v3164_v25 = vpop.permute.xlu1 %1823 }
 0x35f   :  { %1334 = vadd.xlane.f32.xlu0 %v1333_v4  ;;  %v3171_v4 = vpop.permute.xlu0 %1855 }
 0x360   :  { %3854 = vst [vmem:[#allocation24_spill] sm:$0xff] %v3171_v4 }
 0x365   :  { %v1129_v51 = vpop.xlane.xlu1 %1128 }
 0x366   :  { %v1207_v13 = vmul.f32 2.0, %v1129_v51 }
 0x367   :  { %1379 = vadd.xlane.f32.xlu0 %v1378_v17  ;;  %v1135_v17 = vpop.xlane.xlu0 %1134 }
 0x368   :  { %v1239_v51 = vmul.f32 %v1207_v13, %v2964_v39  ;;  %v1250_v39 = vmul.f32 %v1218_v43, %v2817_v0  ;;  %v3212_v13 = vpop.permute.xlu2 %1851  ;;  %v1209_v46 = vmul.f32 2.0, %v1135_v17 }
 0x36a   :  { %v3223_v0 = vsub.f32 %v1250_v39, %v2832_v14  ;;  %v3234_v14 = vsub.f32 %v1238_v58, %v2888_v33  ;;  %v1241_v62 = vmul.f32 %v1209_v46, %v2930_v3 }
 0x36f   :  { %1343 = vadd.xlane.f32.xlu0 %v1342_v2  ;;  %v3209_v2 = vsub.f32 %v1239_v51, %v2991_v53  ;;  %v1339_v53 = vsel %vm622_vm2, %v1299_v63, 0.0  ;;  %v981_v51 = vmul.f32 %v2206_v48, %v980_v50  ;;  %v1180_v43 = vpop.xlane.xlu0 %1179 }
 0x370   :  { %v1224_v17 = vmul.f32 2.0, %v1180_v43 }
 0x371   :  { %v1303_v57 = vmul.f32 %v3209_v2, %v3209_v2  ;;  %v982_v4 = vmul.f32 0.5, %v981_v51 }
 0x372   :  { %v1256_v3 = vmul.f32 %v1224_v17, %v2943_v1 }
 0x373   :  { %v983_v39 = vsub.f32 1.5, %v982_v4  ;;  %v3246_v4 = vsub.f32 %v1253_v42, %v2899_v11 }
 0x374   :  { %1331 = vadd.xlane.f32.xlu2 %v1330_v44  ;;  %v1351_v44 = vsel %vm622_vm2, %v1303_v57, 0.0  ;;  %v1302_v57 = vmul.f32 %v3234_v14, %v3234_v14  ;;  %v3269_v42 = vsub.f32 %v1256_v3, %v2958_v21 }
 0x375   :  { %v984_v47 = vmul.f32 %v2206_v48, %v983_v39 }
 0x376   :  { %v1348_v33 = vsel %vm622_vm2, %v1302_v57, 0.0 }
 0x377   :  { %1388 = vadd.xlane.f32.xlu0 %v1387_v32  ;;  %v3227_v32 = vpop.xlane.xlu2 %1131  ;;  %v3236_v50 = vpop.permute.xlu0 %1831  ;;  %v988_v51 = vsel %vm987_vm1, %v2206_v48, %v984_v47  ;;  %v3262_v48 = vsub.f32 %v1241_v62, %v2950_v38  ;;  %v1320_v38 = vmul.f32 %v3269_v42, %v3269_v42 }
 0x378   :  { %1137 = vadd.xlane.f32.xlu1 %v1136_v5  ;;  %v1314_v5 = vmul.f32 %v3223_v0, %v3223_v0  ;;  %3855 = vst [vmem:[#allocation25_spill] sm:$0xff] %v3236_v50  ;;  %v3252_v58 = vmul.f32 %v2689_v9, %v988_v51 }
 0x379   :  { %v1305_v9 = vmul.f32 %v3262_v48, %v3262_v48 }
 0x37a   :  { %v1384_v63 = vsel %vm622_vm2, %v1314_v5, 0.0  ;;  %v1317_v5 = vmul.f32 %v3246_v4, %v3246_v4 }
 0x37b   :  { %v1357_v39 = vsel %vm622_vm2, %v1305_v9, 0.0 }
 0x37c   :  { %1340 = vadd.xlane.f32.xlu2 %v1339_v53  ;;  %v1393_v11 = vsel %vm622_vm2, %v1317_v5, 0.0 }
 0x37d   :  { %v3276_v47 = vpop.permute.xlu1 %1853 }
 0x37f   :  { %1352 = vadd.xlane.f32.xlu0 %v1351_v44  ;;  %v3241_v53 = vpop.xlane.xlu2 %1176  ;;  %v3248_v44 = vpop.permute.xlu0 %1861 }
 0x380   :  { %3856 = vst [vmem:[#allocation26_spill] sm:$0xff] %v3248_v44 }
 0x384   :  { %1385 = vadd.xlane.f32.xlu2 %v1384_v63 }
 0x387   :  { %v3258_v61 = vpop.permute.xlu2 %1827  ;;  %v1144_v8 = vpop.xlane.xlu0 %1143 }
 0x388   :  { %v1212_v63 = vmul.f32 2.0, %v1144_v8 }
 0x38a   :  { %v1244_v57 = vmul.f32 %v1212_v63, %v2997_v41 }
 0x38c   :  { %1349 = vadd.xlane.f32.xlu2 %v1348_v33  ;;  %v1402_v33 = vsel %vm622_vm2, %v1320_v38, 0.0  ;;  %v3280_v51 = vsub.f32 %v1244_v57, %v3009_v29  ;;  %v2208_v57 = vpop.eup %2207 }
 0x38d   :  { %vm866_vm3 = vweird.f32 %v2208_v57 }
 0x38e   :  { %v1308_v41 = vmul.f32 %v3280_v51, %v3280_v51  ;;  %vm867_vm5 = vmor %vm865_vm4, %vm866_vm3  ;;  %vm1015_vm3 = vweird.f32 %v3041_v26 }
 0x38f   :  { %v3271_v43 = vpop.permute.xlu2 %1857  ;;  %v1189_v1 = vpop.xlane.xlu0 %1188 }
 0x390   :  { %v1227_v46 = vmul.f32 2.0, %v1189_v1  ;;  %v1366_v8 = vsel %vm622_vm2, %v1308_v41, 0.0 }
 0x391   :  { %1859 = vrot.lane.b32.xlu1 %v3252_v58, %s2287_s10 }
 0x392   :  { %v1259_v62 = vmul.f32 %v1227_v46, %v3004_v60 }
 0x394   :  { %1394 = vadd.xlane.f32.xlu2 %v1393_v11  ;;  %v3290_v3 = vsub.f32 %v1259_v62, %v3026_v7  ;;  %v3307_v7 = vld [vmem:[%s3815_s1 + $0xd0] sm:$0xff] }
 0x396   :  { %v1323_v63 = vmul.f32 %v3290_v3, %v3290_v3 }
 0x397   :  { %v3282_v21 = vpop.xlane.xlu2 %1140  ;;  %v3313_v1 = vpop.permute.xlu0 %1837 }
 0x398   :  { %3857 = vst [vmem:[#allocation27_spill] sm:$0xff] %v3313_v1 }
 0x39c   :  { %1358 = vadd.xlane.f32.xlu2 %v1357_v39 }
 0x39f   :  { %v3295_v9 = vpop.xlane.xlu2 %1185 }
 0x3a4   :  { %1403 = vadd.xlane.f32.xlu2 %v1402_v33  ;;  %v860_v33 = vmul.f32 %v2208_v57, %v3032_v30 }
 0x3a6   :  { %v861_v62 = vmul.f32 %v2208_v57, %v860_v33 }
 0x3a7   :  { %v3311_v38 = vpop.permute.xlu2 %1833 }
 0x3a8   :  { %v1174_v5 = vpop.xlane.xlu1 %1173 }
 0x3a9   :  { %v1222_v17 = vmul.f32 2.0, %v1174_v5  ;;  %v862_v5 = vmul.f32 0.5, %v861_v62 }
 0x3ab   :  { %v1254_v11 = vmul.f32 %v1222_v17, %v3021_v28  ;;  %v1411_v28 = vsel %vm622_vm2, %v1323_v63, 0.0 }
 0x3ac   :  { %1367 = vadd.xlane.f32.xlu2 %v1366_v8 }
 0x3ad   :  { %v3293_v29 = vsub.f32 %v1254_v11, %v3076_v22  ;;  %v1097_v22 = vmul.f32 %v3252_v58, %v3307_v7 }
 0x3af   :  { %v1318_v60 = vmul.f32 %v3293_v29, %v3293_v29  ;;  %v1181_v46 = vsel %vm622_vm2, %v1097_v22, 0.0  ;;  %v3317_v17 = vpop.permute.xlu2 %1863 }
 0x3b1   :  { %v1396_v39 = vsel %vm622_vm2, %v1318_v60, 0.0  ;;  %v863_v60 = vsub.f32 1.5, %v862_v5 }
 0x3b2   :  { %1397 = vadd.xlane.f32.xlu0 %v1396_v39 }
 0x3b3   :  { %v864_v22 = vmul.f32 %v2208_v57, %v863_v60 }
 0x3b4   :  { %1412 = vadd.xlane.f32.xlu2 %v1411_v28 }
 0x3b5   :  { %v868_v62 = vsel %vm867_vm5, %v2208_v57, %v864_v22 }
 0x3b7   :  { %v3325_v1 = vpop.xlane.xlu2 %1149 }
 0x3bb   :  { %1182 = vadd.xlane.f32.xlu1 %v1181_v46 }
 0x3bf   :  { %v3341_v30 = vpop.xlane.xlu2 %1194 }
 0x3c0   :  { %v3350_v44 = vpop.permute.xlu1 %1829 }
 0x3c1   :  { %3861 = vst [vmem:[#allocation31_spill] sm:$0xff] %v3350_v44 }
 0x3c2   :  { %v1153_v41 = vpop.xlane.xlu0 %1152 }
 0x3c3   :  { %v1215_v11 = vmul.f32 2.0, %v1153_v41 }
 0x3c5   :  { %v1247_v8 = vmul.f32 %v1215_v11, %v3103_v36  ;;  %v3336_v11 = vmul.f32 %v2718_v45, %v868_v62 }
 0x3c7   :  { %v3321_v63 = vsub.f32 %v1247_v8, %v3111_v59  ;;  %v3346_v45 = vpop.permute.xlu2 %1839 }
 0x3c8   :  { %3860 = vst [vmem:[#allocation30_spill] sm:$0xff] %v3346_v45 }
 0x3c9   :  { %3858 = vst [vmem:[#allocation28_spill] sm:$0xff] %v3321_v63  ;;  %v1311_v39 = vmul.f32 %v3321_v63, %v3321_v63 }
 0x3ca   :  { %v1198_v28 = vpop.xlane.xlu0 %1197 }
 0x3cb   :  { %v1230_v46 = vmul.f32 2.0, %v1198_v28  ;;  %v1375_v33 = vsel %vm622_vm2, %v1311_v39, 0.0 }
 0x3cc   :  { %1376 = vadd.xlane.f32.xlu2 %v1375_v33 }
 0x3cd   :  { %v1262_v36 = vmul.f32 %v1230_v46, %v3127_v31 }
 0x3cf   :  { %v3331_v59 = vsub.f32 %v1262_v36, %v3132_v27 }
 0x3d1   :  { %3859 = vst [vmem:[#allocation29_spill] sm:$0xff] %v3331_v59  ;;  %v1326_v41 = vmul.f32 %v3331_v59, %v3331_v59 }
 0x3d2   :  { %v1335_v5 = vpop.xlane.xlu0 %1334 }
 0x3d3   :  { %2209 = vrsqrt.f32 %v1335_v5  ;;  %v1420_v8 = vsel %vm622_vm2, %v1326_v41, 0.0  ;;  %vm1449_vm7 = vweird.f32 %v1335_v5 }
 0x3d4   :  { %1835 = vrot.lane.b32.xlu1 %v3336_v11, %s2287_s10  ;;  %1421 = vadd.xlane.f32.xlu2 %v1420_v8  ;;  %2211 = vrsqrt.f32 %v3041_v26 }
 0x3d9   :  { %v2210_v57 = vpop.eup %2209 }
 0x3da   :  { %v1444_v27 = vmul.f32 %v2210_v57, %v1335_v5  ;;  %v1380_v60 = vpop.xlane.xlu0 %1379  ;;  %v3344_v22 = vpop.eup %2211  ;;  %vm1450_vm6 = vweird.f32 %v2210_v57 }
 0x3db   :  { %2213 = vrsqrt.f32 %v1380_v60  ;;  %v1010_v36 = vmul.f32 %v3344_v22, %v3041_v26  ;;  %vm1451_vm8 = vmor %vm1449_vm7, %vm1450_vm6  ;;  %vm1599_vm12 = vweird.f32 %v1380_v60  ;;  %vm1016_vm15 = vweird.f32 %v3344_v22 }
 0x3dc   :  { %v1445_v39 = vmul.f32 %v2210_v57, %v1444_v27  ;;  %vm3401_vm4 = vmor %vm1015_vm3, %vm1016_vm15 }
 0x3de   :  { %v1446_v28 = vmul.f32 0.5, %v1445_v39 }
 0x3e0   :  { %v1447_v46 = vsub.f32 1.5, %v1446_v28  ;;  %v1011_v28 = vmul.f32 %v3344_v22, %v1010_v36 }
 0x3e1   :  { %v2214_v33 = vpop.eup %2213 }
 0x3e2   :  { %v1448_v62 = vmul.f32 %v2210_v57, %v1447_v46  ;;  %v1594_v41 = vmul.f32 %v2214_v33, %v1380_v60  ;;  %v1344_v8 = vpop.xlane.xlu0 %1343  ;;  %vm1600_vm11 = vweird.f32 %v2214_v33  ;;  %v3862_v60 = vld [vmem:[#allocation20_spill] sm:$0xff] }
 0x3e3   :  { %2215 = vrsqrt.f32 %v1344_v8  ;;  %vm1601_vm13 = vmor %vm1599_vm12, %vm1600_vm11  ;;  %vm1479_vm0 = vweird.f32 %v1344_v8 }
 0x3e4   :  { %v1452_v27 = vsel %vm1451_vm8, %v2210_v57, %v1448_v62  ;;  %v1595_v39 = vmul.f32 %v2214_v33, %v1594_v41 }
 0x3e5   :  { %v1745_v50 = vmul.f32 %v1452_v27, %v3143_v12  ;;  %v1012_v12 = vmul.f32 0.5, %v1011_v28 }
 0x3e6   :  { %v1596_v6 = vmul.f32 0.5, %v1595_v39 }
 0x3e7   :  { %v1905_v49 = vsel %vm622_vm2, %v1745_v50, %v3067_v37  ;;  %v3356_v46 = vpop.xlane.xlu2 %1331 }
 0x3e8   :  { %v1938_v5 = vsel %vm1935_vm9, %v1905_v49, 0.0  ;;  %v1597_v59 = vsub.f32 1.5, %v1596_v6  ;;  %2217 = vrsqrt.f32 %v3356_v46  ;;  %vm1439_vm6 = vweird.f32 %v3356_v46 }
 0x3e9   :  { %v2216_v57 = vpop.eup %2215  ;;  %1971 = vst.msk [vmem:[%s3816_s6 + $0x10] sm:$0xff] %vm1968_vm10, %v1938_v5  ;;  %v1013_v5 = vsub.f32 1.5, %v1012_v12 }
 0x3ea   :  { %v1598_v36 = vmul.f32 %v2214_v33, %v1597_v59  ;;  %v1474_v62 = vmul.f32 %v2216_v57, %v1344_v8  ;;  %v3364_v41 = vpop.xlane.xlu0 %1388  ;;  %vm1480_vm14 = vweird.f32 %v2216_v57 }
 0x3eb   :  { %2219 = vrsqrt.f32 %v3364_v41  ;;  %v1138_v49 = vpop.xlane.xlu1 %1137  ;;  %v1014_v12 = vmul.f32 %v3344_v22, %v1013_v5  ;;  %vm1481_vm1 = vmor %vm1479_vm0, %vm1480_vm14  ;;  %vm1629_vm11 = vweird.f32 %v3364_v41 }
 0x3ec   :  { %v1602_v37 = vsel %vm1601_vm13, %v2214_v33, %v1598_v36  ;;  %v1475_v6 = vmul.f32 %v2216_v57, %v1474_v62  ;;  %v1210_v50 = vmul.f32 2.0, %v1138_v49  ;;  %1869 = vrot.lane.b32.xlu2 %v3127_v31, %s2287_s10 }
 0x3ed   :  { %v1760_v27 = vmul.f32 %v1602_v37, %v3154_v24 }
 0x3ee   :  { %v2218_v39 = vpop.eup %2217  ;;  %v1476_v28 = vmul.f32 0.5, %v1475_v6  ;;  %v1242_v59 = vmul.f32 %v1210_v50, %v3119_v18 }
 0x3ef   :  { %v1920_v44 = vsel %vm622_vm2, %v1760_v27, %v3862_v60  ;;  %v1434_v45 = vmul.f32 %v2218_v39, %v3356_v46  ;;  %v3374_v63 = vpop.xlane.xlu2 %1340  ;;  %vm1440_vm5 = vweird.f32 %v2218_v39  ;;  %v1018_v60 = vsel %vm3401_vm4, %v3344_v22, %v1014_v12  ;;  %v3865_v12 = vld [vmem:[#allocation14_spill] sm:$0xff] }
 0x3f0   :  { %v1953_v33 = vsel %vm1935_vm9, %v1920_v44, 0.0  ;;  %v1477_v36 = vsub.f32 1.5, %v1476_v28  ;;  %2221 = vrsqrt.f32 %v3374_v63  ;;  %v3384_v24 = vsub.f32 %v1242_v59, %v3195_v34  ;;  %v3396_v34 = vld [vmem:[%s3815_s1 + $0x70] sm:$0xff]  ;;  %vm1441_vm7 = vmor %vm1439_vm6, %vm1440_vm5 }
 0x3f1   :  { %v2220_v31 = vpop.eup %2219  ;;  %1986 = vst.msk [vmem:[%s3816_s6 + $0x88] sm:$0xff] %vm1968_vm10, %v1953_v33  ;;  %v1435_v18 = vmul.f32 %v2218_v39, %v1434_v45  ;;  %vm1469_vm14 = vweird.f32 %v3374_v63 }
 0x3f2   :  { %v1478_v62 = vmul.f32 %v2216_v57, %v1477_v36  ;;  %v1624_v44 = vmul.f32 %v2220_v31, %v3364_v41  ;;  %v3388_v49 = vpop.xlane.xlu0 %1352  ;;  %v1306_v6 = vmul.f32 %v3384_v24, %v3384_v24  ;;  %vm1630_vm8 = vweird.f32 %v2220_v31 }
 0x3f3   :  { %v1436_v37 = vmul.f32 0.5, %v1435_v18  ;;  %2223 = vrsqrt.f32 %v3388_v49  ;;  %vm1631_vm12 = vmor %vm1629_vm11, %vm1630_vm8 }
 0x3f4   :  { %v1482_v45 = vsel %vm1481_vm1, %v2216_v57, %v1478_v62  ;;  %v1625_v8 = vmul.f32 %v2220_v31, %v1624_v44  ;;  %v1360_v28 = vsel %vm622_vm2, %v1306_v6, 0.0  ;;  %v1085_v57 = vmul.f32 %v3336_v11, %v3396_v34  ;;  %v3866_v6 = vld [vmem:[#allocation2_spill] sm:$0xff] }
 0x3f5   :  { %v1748_v27 = vmul.f32 %v1482_v45, %v3168_v20  ;;  %v1437_v5 = vsub.f32 1.5, %v1436_v37  ;;  %1361 = vadd.xlane.f32.xlu0 %v1360_v28  ;;  %v1199_v37 = vmul.f32 2.0, %v3865_v12  ;;  %v3426_v45 = vmul.f32 %v3866_v6, %v1018_v60  ;;  %v3434_v28 = vld [vmem:[%s3815_s1 + $0xe8] sm:$0xff] }
 0x3f6   :  { %v2222_v59 = vpop.eup %2221  ;;  %v1626_v26 = vmul.f32 0.5, %v1625_v8  ;;  %vm1509_vm1 = vweird.f32 %v3388_v49 }
 0x3f7   :  { %v1908_v33 = vsel %vm622_vm2, %v1748_v27, %v3098_v35  ;;  %v1438_v36 = vmul.f32 %v2218_v39, %v1437_v5  ;;  %v1464_v20 = vmul.f32 %v2222_v59, %v3374_v63  ;;  %v3416_v18 = vpop.xlane.xlu2 %1385  ;;  %vm1470_vm13 = vweird.f32 %v2222_v59 }
 0x3f8   :  { %v1941_v62 = vsel %vm1935_vm9, %v1908_v33, 0.0  ;;  %v1627_v44 = vsub.f32 1.5, %v1626_v26  ;;  %2225 = vrsqrt.f32 %v3416_v18  ;;  %v3867_v26 = vld [vmem:[#allocation17_spill] sm:$0xff]  ;;  %vm1471_vm15 = vmor %vm1469_vm14, %vm1470_vm13  ;;  %vm1619_vm5 = vweird.f32 %v3416_v18 }
 0x3f9   :  { %v2224_v22 = vpop.eup %2223  ;;  %1974 = vst.msk [vmem:[%s3816_s6 + $0x28] sm:$0xff] %vm1968_vm10, %v1941_v62  ;;  %v1442_v35 = vsel %vm1441_vm7, %v2218_v39, %v1438_v36  ;;  %v1465_v46 = vmul.f32 %v2222_v59, %v1464_v20  ;;  %v1145_v36 = vsel %vm622_vm2, %v1085_v57, 0.0 }
 0x3fa   :  { %v1744_v8 = vmul.f32 %v1442_v35, %v3180_v23  ;;  %v1628_v50 = vmul.f32 %v2220_v31, %v1627_v44  ;;  %v1504_v27 = vmul.f32 %v2224_v22, %v3388_v49  ;;  %v3868_v44 = vld [vmem:[#allocation3_spill] sm:$0xff]  ;;  %vm1510_vm0 = vweird.f32 %v2224_v22 }
 0x3fb   :  { %v1466_v5 = vmul.f32 0.5, %v1465_v46  ;;  %v1231_v12 = vmul.f32 %v1199_v37, %v3868_v44  ;;  %vm1511_vm3 = vmor %vm1509_vm1, %vm1510_vm0 }
 0x3fc   :  { %v1904_v39 = vsel %vm622_vm2, %v1744_v8, %v3867_v26  ;;  %v1632_v33 = vsel %vm1631_vm12, %v2220_v31, %v1628_v50  ;;  %v1505_v60 = vmul.f32 %v2224_v22, %v1504_v27  ;;  %v1100_v31 = vmul.f32 %v3426_v45, %v3434_v28 }
 0x3fd   :  { %v1937_v23 = vsel %vm1935_vm9, %v1904_v39, 0.0  ;;  %v1763_v41 = vmul.f32 %v1632_v33, %v3186_v40  ;;  %v1467_v20 = vsub.f32 1.5, %v1466_v5  ;;  %v3869_v39 = vld [vmem:[#allocation19_spill] sm:$0xff] }
 0x3fe   :  { %v2226_v62 = vpop.eup %2225  ;;  %1970 = vst.msk [vmem:[%s3816_s6 + $0x8] sm:$0xff] %vm1968_vm10, %v1937_v23  ;;  %v1506_v35 = vmul.f32 0.5, %v1505_v60  ;;  %1146 = vadd.xlane.f32.xlu1 %v1145_v36  ;;  %v1190_v26 = vsel %vm622_vm2, %v1100_v31, 0.0  ;;  %v1202_v33 = vmul.f32 2.0, %v3869_v39 }
 0x3ff   :  { %v1923_v57 = vsel %vm622_vm2, %v1763_v41, %v3139_v54  ;;  %v1468_v46 = vmul.f32 %v2222_v59, %v1467_v20  ;;  %v1614_v40 = vmul.f32 %v2226_v62, %v3416_v18  ;;  %v1350_v6 = vpop.xlane.xlu2 %1349  ;;  %vm1620_vm4 = vweird.f32 %v2226_v62 }
 0x400   :  { %v1956_v37 = vsel %vm1935_vm9, %v1923_v57, 0.0  ;;  %v1507_v8 = vsub.f32 1.5, %v1506_v35  ;;  %2227 = vrsqrt.f32 %v1350_v6  ;;  %v3870_v35 = vld [vmem:[#allocation4_spill] sm:$0xff]  ;;  %vm1621_vm6 = vmor %vm1619_vm5, %vm1620_vm4  ;;  %vm1499_vm8 = vweird.f32 %v1350_v6 }
 0x401   :  { %1989 = vst.msk [vmem:[%s3816_s6 + $0xa0] sm:$0xff] %vm1968_vm10, %v1956_v37  ;;  %v1472_v50 = vsel %vm1471_vm15, %v2222_v59, %v1468_v46  ;;  %v1615_v27 = vmul.f32 %v2226_v62, %v1614_v40  ;;  %v2276_v59 = vld [vmem:[%s3815_s1] sm:$0xff]  ;;  %v1234_v31 = vmul.f32 %v1202_v33, %v3870_v35  ;;  %v1217_v37 = vmul.f32 2.0, %v3095_v56 }
 0x402   :  { %v1747_v54 = vmul.f32 %v1472_v50, %v3205_v19  ;;  %v1508_v5 = vmul.f32 %v2224_v22, %v1507_v8  ;;  %v3466_v23 = vsub.f32 %v1231_v12, %v2276_v59  ;;  %v2277_v50 = vld [vmem:[%s3815_s1 + $0x18] sm:$0xff] }
 0x403   :  { %v1616_v63 = vmul.f32 0.5, %v1615_v27  ;;  %v3492_v27 = vsub.f32 %v1234_v31, %v2277_v50 }
 0x404   :  { %v1907_v60 = vsel %vm622_vm2, %v1747_v54, %v3106_v52  ;;  %v1512_v36 = vsel %vm1511_vm3, %v2224_v22, %v1508_v5 }
 0x405   :  { %v1940_v19 = vsel %vm1935_vm9, %v1907_v60, 0.0  ;;  %v1751_v49 = vmul.f32 %v1512_v36, %v3209_v2  ;;  %v1617_v41 = vsub.f32 1.5, %v1616_v63  ;;  %v1298_v33 = vmul.f32 %v3492_v27, %v3492_v27 }
 0x406   :  { %v2228_v20 = vpop.eup %2227  ;;  %1973 = vst.msk [vmem:[%s3816_s6 + $0x20] sm:$0xff] %vm1968_vm10, %v1940_v19  ;;  %1191 = vadd.xlane.f32.xlu1 %v1190_v26  ;;  %v3871_v26 = vld [vmem:[#allocation5_spill] sm:$0xff] }
 0x407   :  { %v1911_v52 = vsel %vm622_vm2, %v1751_v49, %v3164_v25  ;;  %v1618_v22 = vmul.f32 %v2226_v62, %v1617_v41  ;;  %v1494_v44 = vmul.f32 %v2228_v20, %v1350_v6  ;;  %v1395_v12 = vpop.xlane.xlu2 %1394  ;;  %v1295_v25 = vmul.f32 %v3466_v23, %v3466_v23  ;;  %v2278_v6 = vld [vmem:[%s3815_s1 + $0x90] sm:$0xff] }
 0x408   :  { %v1944_v2 = vsel %vm1935_vm9, %v1911_v52, 0.0  ;;  %2229 = vrsqrt.f32 %v1395_v12  ;;  %vm1500_vm7 = vweird.f32 %v2228_v20  ;;  %v1249_v39 = vmul.f32 %v1217_v37, %v3871_v26 }
 0x409   :  { %1977 = vst.msk [vmem:[%s3816_s6 + $0x40] sm:$0xff] %vm1968_vm10, %v1944_v2  ;;  %v1622_v57 = vsel %vm1621_vm6, %v2226_v62, %v1618_v22  ;;  %v1495_v46 = vmul.f32 %v2228_v20, %v1494_v44  ;;  %v1327_v5 = vsel %vm622_vm2, %v1295_v25, 0.0  ;;  %vm1501_vm11 = vmor %vm1499_vm8, %vm1500_vm7  ;;  %v1336_v41 = vsel %vm622_vm2, %v1298_v33, 0.0  ;;  %v3872_v2 = vld [vmem:[#allocation6_spill] sm:$0xff] }
 0x40a   :  { %v1762_v18 = vmul.f32 %v1622_v57, %v3223_v0  ;;  %v3510_v52 = vsub.f32 %v1249_v39, %v2278_v6  ;;  %v1205_v22 = vmul.f32 2.0, %v3147_v55  ;;  %vm1649_vm13 = vweird.f32 %v1395_v12 }
 0x40b   :  { %v1496_v40 = vmul.f32 0.5, %v1495_v46  ;;  %v1220_v37 = vmul.f32 2.0, %v3162_v10 }
 0x40c   :  { %v1922_v8 = vsel %vm622_vm2, %v1762_v18, %v3134_v15  ;;  %v1313_v55 = vmul.f32 %v3510_v52, %v3510_v52  ;;  %v1237_v57 = vmul.f32 %v1205_v22, %v3872_v2 }
 0x40d   :  { %v1955_v62 = vsel %vm1935_vm9, %v1922_v8, 0.0  ;;  %v1497_v54 = vsub.f32 1.5, %v1496_v40 }
 0x40e   :  { %v2230_v63 = vpop.eup %2229  ;;  %1988 = vst.msk [vmem:[%s3816_s6 + $0x98] sm:$0xff] %vm1968_vm10, %v1955_v62  ;;  %1328 = vadd.xlane.f32.xlu1 %v1327_v5 }
 0x40f   :  { %v1498_v56 = vmul.f32 %v2228_v20, %v1497_v54  ;;  %v1644_v15 = vmul.f32 %v2230_v63, %v1395_v12  ;;  %v1359_v0 = vpop.xlane.xlu2 %1358  ;;  %vm1650_vm12 = vweird.f32 %v2230_v63  ;;  %v1381_v12 = vsel %vm622_vm2, %v1313_v55, 0.0  ;;  %v2279_v54 = vld [vmem:[%s3815_s1 + $0x30] sm:$0xff] }
 0x410   :  { %2231 = vrsqrt.f32 %v1359_v0  ;;  %vm1651_vm14 = vmor %vm1649_vm13, %vm1650_vm12  ;;  %v3530_v5 = vsub.f32 %v1237_v57, %v2279_v54  ;;  %vm1529_vm0 = vweird.f32 %v1359_v0 }
 0x411   :  { %v1502_v60 = vsel %vm1501_vm11, %v2228_v20, %v1498_v56  ;;  %v1645_v36 = vmul.f32 %v2230_v63, %v1644_v15  ;;  %v3873_v56 = vld [vmem:[#allocation7_spill] sm:$0xff] }
 0x412   :  { %v1750_v59 = vmul.f32 %v1502_v60, %v3234_v14  ;;  %v1252_v15 = vmul.f32 %v1220_v37, %v3873_v56  ;;  %v1301_v33 = vmul.f32 %v3530_v5, %v3530_v5  ;;  %v1208_v60 = vmul.f32 2.0, %v3227_v32 }
 0x413   :  { %v1646_v19 = vmul.f32 0.5, %v1645_v36 }
 0x414   :  { %v1910_v49 = vsel %vm622_vm2, %v1750_v59, %v3182_v16 }
 0x415   :  { %v1943_v44 = vsel %vm1935_vm9, %v1910_v49, 0.0  ;;  %v1647_v20 = vsub.f32 1.5, %v1646_v19 }
 0x416   :  { %v2232_v35 = vpop.eup %2231  ;;  %1976 = vst.msk [vmem:[%s3816_s6 + $0x38] sm:$0xff] %vm1968_vm10, %v1943_v44  ;;  %1337 = vadd.xlane.f32.xlu1 %v1336_v41  ;;  %v1345_v44 = vsel %vm622_vm2, %v1301_v33, 0.0 }
 0x417   :  { %v1648_v16 = vmul.f32 %v2230_v63, %v1647_v20  ;;  %v1524_v14 = vmul.f32 %v2232_v35, %v1359_v0  ;;  %v1404_v31 = vpop.xlane.xlu2 %1403  ;;  %vm1530_vm15 = vweird.f32 %v2232_v35  ;;  %v2280_v0 = vld [vmem:[%s3815_s1 + $0xa8] sm:$0xff]  ;;  %v3874_v20 = vld [vmem:[#allocation8_spill] sm:$0xff] }
 0x418   :  { %2233 = vrsqrt.f32 %v1404_v31  ;;  %vm1531_vm1 = vmor %vm1529_vm0, %vm1530_vm15  ;;  %v3546_v49 = vsub.f32 %v1252_v15, %v2280_v0  ;;  %vm1679_vm4 = vweird.f32 %v1404_v31 }
 0x419   :  { %v1652_v46 = vsel %vm1651_vm14, %v2230_v63, %v1648_v16  ;;  %v1525_v25 = vmul.f32 %v2232_v35, %v1524_v14 }
 0x41a   :  { %v1765_v18 = vmul.f32 %v1652_v46, %v3246_v4  ;;  %v1316_v55 = vmul.f32 %v3546_v49, %v3546_v49  ;;  %v1223_v46 = vmul.f32 2.0, %v3241_v53 }
 0x41b   :  { %v1526_v40 = vmul.f32 0.5, %v1525_v25 }
 0x41c   :  { %v1925_v8 = vsel %vm622_vm2, %v1765_v18, %v3212_v13  ;;  %v2281_v18 = vld [vmem:[%s3815_s1 + $0x48] sm:$0xff] }
 0x41d   :  { %v1958_v50 = vsel %vm1935_vm9, %v1925_v8, 0.0  ;;  %v1527_v62 = vsub.f32 1.5, %v1526_v40 }
 0x41e   :  { %v2234_v63 = vpop.eup %2233  ;;  %1991 = vst.msk [vmem:[%s3816_s6 + $0xb0] sm:$0xff] %vm1968_vm10, %v1958_v50  ;;  %1382 = vadd.xlane.f32.xlu1 %v1381_v12  ;;  %v1390_v12 = vsel %vm622_vm2, %v1316_v55, 0.0 }
 0x41f   :  { %v1528_v10 = vmul.f32 %v2232_v35, %v1527_v62  ;;  %v1674_v13 = vmul.f32 %v2234_v63, %v1404_v31  ;;  %v1368_v4 = vpop.xlane.xlu2 %1367  ;;  %vm1680_vm3 = vweird.f32 %v2234_v63 }
 0x420   :  { %2235 = vrsqrt.f32 %v1368_v4  ;;  %vm1681_vm5 = vmor %vm1679_vm4, %vm1680_vm3  ;;  %vm1559_vm7 = vweird.f32 %v1368_v4 }
 0x421   :  { %v1532_v26 = vsel %vm1531_vm1, %v2232_v35, %v1528_v10  ;;  %v1675_v39 = vmul.f32 %v2234_v63, %v1674_v13  ;;  %v3551_v35 = vpop.permute.xlu1 %1859 }
 0x422   :  { %v1753_v36 = vmul.f32 %v1532_v26, %v3262_v48  ;;  %v1240_v48 = vmul.f32 %v1208_v60, %v3874_v20 }
 0x423   :  { %v1676_v59 = vmul.f32 0.5, %v1675_v39 }
 0x424   :  { %v1913_v19 = vsel %vm622_vm2, %v1753_v36, %v3258_v61  ;;  %v3564_v40 = vsub.f32 %v1240_v48, %v2281_v18 }
 0x425   :  { %v1946_v41 = vsel %vm1935_vm9, %v1913_v19, 0.0  ;;  %v1677_v6 = vsub.f32 1.5, %v1676_v59  ;;  %v1398_v22 = vpop.xlane.xlu0 %1397 }
 0x426   :  { %v2236_v32 = vpop.eup %2235  ;;  %1979 = vst.msk [vmem:[%s3816_s6 + $0x50] sm:$0xff] %vm1968_vm10, %v1946_v41  ;;  %2237 = vrsqrt.f32 %v1398_v22  ;;  %1346 = vadd.xlane.f32.xlu1 %v1345_v44  ;;  %v1211_v44 = vmul.f32 2.0, %v3282_v21  ;;  %vm1659_vm12 = vweird.f32 %v1398_v22 }
 0x427   :  { %v1678_v61 = vmul.f32 %v2234_v63, %v1677_v6  ;;  %v1554_v16 = vmul.f32 %v2236_v32, %v1368_v4  ;;  %v1413_v14 = vpop.xlane.xlu2 %1412  ;;  %vm1560_vm6 = vweird.f32 %v2236_v32  ;;  %v2282_v4 = vld [vmem:[%s3815_s1 + $0xc0] sm:$0xff] }
 0x428   :  { %2239 = vrsqrt.f32 %v1413_v14  ;;  %vm1561_vm8 = vmor %vm1559_vm7, %vm1560_vm6  ;;  %vm1709_vm15 = vweird.f32 %v1413_v14 }
 0x429   :  { %v1682_v2 = vsel %vm1681_vm5, %v2234_v63, %v1678_v61  ;;  %v1555_v57 = vmul.f32 %v2236_v32, %v1554_v16  ;;  %v3876_v16 = vld [vmem:[#allocation10_spill] sm:$0xff] }
 0x42a   :  { %v1768_v25 = vmul.f32 %v1682_v2, %v3269_v42  ;;  %v3875_v42 = vld [vmem:[#allocation9_spill] sm:$0xff]  ;;  %v1243_v55 = vmul.f32 %v1211_v44, %v3876_v16  ;;  %v2286_v16 = vld [vmem:[%s3815_s1 + $0xf0] sm:$0xff] }
 0x42b   :  { %v1556_v31 = vmul.f32 0.5, %v1555_v57  ;;  %v1255_v63 = vmul.f32 %v1223_v46, %v3875_v42 }
 0x42c   :  { %v2238_v37 = vpop.eup %2237  ;;  %v1928_v8 = vsel %vm622_vm2, %v1768_v25, %v3271_v43  ;;  %v1304_v43 = vmul.f32 %v3564_v40, %v3564_v40 }
 0x42d   :  { %v1961_v50 = vsel %vm1935_vm9, %v1928_v8, 0.0  ;;  %v1557_v62 = vsub.f32 1.5, %v1556_v31  ;;  %v1654_v53 = vmul.f32 %v2238_v37, %v1398_v22  ;;  %vm1660_vm11 = vweird.f32 %v2238_v37 }
 0x42e   :  { %v2240_v54 = vpop.eup %2239  ;;  %1994 = vst.msk [vmem:[%s3816_s6 + $0xc8] sm:$0xff] %vm1968_vm10, %v1961_v50  ;;  %v1183_v10 = vpop.xlane.xlu1 %1182  ;;  %1391 = vadd.xlane.f32.xlu1 %v1390_v12  ;;  %v1354_v19 = vsel %vm622_vm2, %v1304_v43, 0.0  ;;  %v3583_v6 = vsub.f32 %v1255_v63, %v2282_v4  ;;  %vm1661_vm14 = vmor %vm1659_vm12, %vm1660_vm11  ;;  %v1214_v50 = vmul.f32 2.0, %v3325_v1  ;;  %v3878_v43 = vld [vmem:[#allocation16_spill] sm:$0xff]  ;;  %v3879_v4 = vld [vmem:[#allocation18_spill] sm:$0xff] }
 0x42f   :  { %v1558_v13 = vmul.f32 %v2236_v32, %v1557_v62  ;;  %v1655_v56 = vmul.f32 %v2238_v37, %v1654_v53  ;;  %v1704_v15 = vmul.f32 %v2240_v54, %v1413_v14  ;;  %v1225_v26 = vmul.f32 2.0, %v1183_v10  ;;  %v2284_v53 = vld [vmem:[%s3815_s1 + $0xd8] sm:$0xff] }
 0x430   :  { %vm1710_vm13 = vweird.f32 %v2240_v54  ;;  %v1319_v57 = vmul.f32 %v3583_v6, %v3583_v6  ;;  %v1226_v14 = vmul.f32 2.0, %v3295_v9 }
 0x431   :  { %v1562_v39 = vsel %vm1561_vm8, %v2236_v32, %v1558_v13  ;;  %v1656_v33 = vmul.f32 0.5, %v1655_v56  ;;  %v1705_v60 = vmul.f32 %v2240_v54, %v1704_v15  ;;  %v1257_v59 = vmul.f32 %v1225_v26, %v3252_v58  ;;  %vm1711_vm0 = vmor %vm1709_vm15, %vm1710_vm13  ;;  %v2285_v26 = vld [vmem:[%s3815_s1 + $0x78] sm:$0xff] }
 0x432   :  { %v1756_v36 = vmul.f32 %v1562_v39, %v3280_v51  ;;  %v1246_v13 = vmul.f32 %v1214_v50, %v3878_v43 }
 0x433   :  { %v1657_v0 = vsub.f32 1.5, %v1656_v33  ;;  %v1706_v41 = vmul.f32 0.5, %v1705_v60  ;;  %v3589_v51 = vsub.f32 %v1257_v59, %v3307_v7  ;;  %v1229_v33 = vmul.f32 2.0, %v3341_v30 }
 0x434   :  { %v1916_v32 = vsel %vm622_vm2, %v1756_v36, %v3311_v38  ;;  %v3641_v39 = vsub.f32 %v1246_v13, %v2285_v26 }
 0x435   :  { %v1949_v58 = vsel %vm1935_vm9, %v1916_v32, 0.0  ;;  %v1658_v20 = vmul.f32 %v2238_v37, %v1657_v0  ;;  %v1707_v48 = vsub.f32 1.5, %v1706_v41  ;;  %v1321_v21 = vmul.f32 %v3589_v51, %v3589_v51 }
 0x436   :  { %1982 = vst.msk [vmem:[%s3816_s6 + $0x68] sm:$0xff] %vm1968_vm10, %v1949_v58  ;;  %1355 = vadd.xlane.f32.xlu1 %v1354_v19  ;;  %v1310_v41 = vmul.f32 %v3641_v39, %v3641_v39  ;;  %v1261_v44 = vmul.f32 %v1229_v33, %v3879_v4  ;;  %v3883_v33 = vld [vmem:[#allocation31_spill] sm:$0xff] }
 0x437   :  { %v1662_v38 = vsel %vm1661_vm14, %v2238_v37, %v1658_v20  ;;  %v1708_v22 = vmul.f32 %v2240_v54, %v1707_v48  ;;  %v1405_v61 = vsel %vm622_vm2, %v1321_v21, 0.0  ;;  %v1399_v37 = vsel %vm622_vm2, %v1319_v57, 0.0  ;;  %v3880_v20 = vld [vmem:[#allocation28_spill] sm:$0xff]  ;;  %v3881_v21 = vld [vmem:[#allocation30_spill] sm:$0xff] }
 0x438   :  { %v1766_v7 = vmul.f32 %v1662_v38, %v3293_v29  ;;  %1406 = vadd.xlane.f32.xlu0 %v1405_v61 }
 0x439   :  { %v1712_v2 = vsel %vm1711_vm0, %v2240_v54, %v1708_v22  ;;  %v1372_v22 = vsel %vm622_vm2, %v1310_v41, 0.0 }
 0x43a   :  { %v1926_v46 = vsel %vm622_vm2, %v1766_v7, %v3276_v47  ;;  %v1771_v25 = vmul.f32 %v1712_v2, %v3290_v3  ;;  %v2283_v47 = vld [vmem:[%s3815_s1 + $0x60] sm:$0xff] }
 0x43b   :  { %v1959_v18 = vsel %vm1935_vm9, %v1926_v46, 0.0  ;;  %v3619_v3 = vsub.f32 %v1243_v55, %v2283_v47  ;;  %v3656_v55 = vsub.f32 %v1261_v44, %v2286_v16  ;;  %v3884_v16 = vld [vmem:[#allocation12_spill] sm:$0xff] }
 0x43c   :  { %1992 = vst.msk [vmem:[%s3816_s6 + $0xb8] sm:$0xff] %vm1968_vm10, %v1959_v18  ;;  %v1931_v29 = vsel %vm622_vm2, %v1771_v25, %v3317_v17  ;;  %v3877_v17 = vld [vmem:[#allocation11_spill] sm:$0xff]  ;;  %v3882_v25 = vld [vmem:[#allocation29_spill] sm:$0xff] }
 0x43d   :  { %v1964_v31 = vsel %vm1935_vm9, %v1931_v29, 0.0  ;;  %v1258_v9 = vmul.f32 %v1226_v14, %v3877_v17  ;;  %v1307_v12 = vmul.f32 %v3619_v3, %v3619_v3  ;;  %v1325_v46 = vmul.f32 %v3656_v55, %v3656_v55 }
 0x43e   :  { %1997 = vst.msk [vmem:[%s3816_s6 + $0xe0] sm:$0xff] %vm1968_vm10, %v1964_v31  ;;  %1400 = vadd.xlane.f32.xlu1 %v1399_v37 }
 0x43f   :  { %v1377_v8 = vpop.xlane.xlu2 %1376  ;;  %v1363_v62 = vsel %vm622_vm2, %v1307_v12, 0.0  ;;  %v3633_v54 = vsub.f32 %v1258_v9, %v2284_v53  ;;  %v1417_v37 = vsel %vm622_vm2, %v1325_v46, 0.0 }
 0x440   :  { %2241 = vrsqrt.f32 %v1377_v8  ;;  %vm1589_vm3 = vweird.f32 %v1377_v8 }
 0x441   :  { %v1322_v15 = vmul.f32 %v3633_v54, %v3633_v54 }
 0x443   :  { %v1408_v36 = vsel %vm622_vm2, %v1322_v15, 0.0 }
 0x446   :  { %v2242_v42 = vpop.eup %2241  ;;  %1364 = vadd.xlane.f32.xlu1 %v1363_v62  ;;  %v3672_v47 = vpop.permute.xlu1 %1835 }
 0x447   :  { %v1584_v63 = vmul.f32 %v2242_v42, %v1377_v8  ;;  %v1422_v10 = vpop.xlane.xlu2 %1421  ;;  %vm1590_vm1 = vweird.f32 %v2242_v42 }
 0x448   :  { %2243 = vrsqrt.f32 %v1422_v10  ;;  %vm1591_vm4 = vmor %vm1589_vm3, %vm1590_vm1  ;;  %vm1739_vm6 = vweird.f32 %v1422_v10 }
 0x449   :  { %v1585_v56 = vmul.f32 %v2242_v42, %v1584_v63 }
 0x44b   :  { %v1586_v1 = vmul.f32 0.5, %v1585_v56 }
 0x44d   :  { %v1587_v60 = vsub.f32 1.5, %v1586_v1 }
 0x44e   :  { %v2244_v59 = vpop.eup %2243  ;;  %1409 = vadd.xlane.f32.xlu1 %v1408_v36 }
 0x44f   :  { %v1588_v19 = vmul.f32 %v2242_v42, %v1587_v60  ;;  %v1734_v0 = vmul.f32 %v2244_v59, %v1422_v10  ;;  %vm1740_vm5 = vweird.f32 %v2244_v59  ;;  %v1870_v29 = vpop.permute.xlu2 %1869 }
 0x450   :  { %vm1741_vm7 = vmor %vm1739_vm6, %vm1740_vm5 }
 0x451   :  { %v1592_v32 = vsel %vm1591_vm4, %v2242_v42, %v1588_v19  ;;  %v1735_v58 = vmul.f32 %v2244_v59, %v1734_v0 }
 0x452   :  { %v1759_v48 = vmul.f32 %v1592_v32, %v3880_v20 }
 0x453   :  { %v1736_v30 = vmul.f32 0.5, %v1735_v58 }
 0x454   :  { %v1919_v38 = vsel %vm622_vm2, %v1759_v48, %v3881_v21 }
 0x455   :  { %v1952_v7 = vsel %vm1935_vm9, %v1919_v38, 0.0  ;;  %v1737_v61 = vsub.f32 1.5, %v1736_v30 }
 0x456   :  { %1985 = vst.msk [vmem:[%s3816_s6 + $0x80] sm:$0xff] %vm1968_vm10, %v1952_v7  ;;  %1373 = vadd.xlane.f32.xlu1 %v1372_v22 }
 0x457   :  { %v1738_v2 = vmul.f32 %v2244_v59, %v1737_v61 }
 0x459   :  { %v1742_v57 = vsel %vm1741_vm7, %v2244_v59, %v1738_v2 }
 0x45a   :  { %v1774_v18 = vmul.f32 %v1742_v57, %v3882_v25 }
 0x45c   :  { %v1934_v14 = vsel %vm622_vm2, %v1774_v18, %v1870_v29 }
 0x45d   :  { %v1967_v31 = vsel %vm1935_vm9, %v1934_v14, 0.0 }
 0x45e   :  { %2000 = vst.msk [vmem:[%s3816_s6 + $0xf8] sm:$0xff] %vm1968_vm10, %v1967_v31  ;;  %1418 = vadd.xlane.f32.xlu1 %v1417_v37 }
 0x468   :  { %v1362_v8 = vpop.xlane.xlu0 %1361 }
 0x469   :  { %2245 = vrsqrt.f32 %v1362_v8  ;;  %vm1539_vm11 = vweird.f32 %v1362_v8 }
 0x46f   :  { %v2246_v17 = vpop.eup %2245 }
 0x470   :  { %v1534_v9 = vmul.f32 %v2246_v17, %v1362_v8  ;;  %vm1540_vm8 = vweird.f32 %v2246_v17 }
 0x471   :  { %v1147_v12 = vpop.xlane.xlu1 %1146  ;;  %vm1541_vm12 = vmor %vm1539_vm11, %vm1540_vm8 }
 0x472   :  { %v1213_v50 = vmul.f32 2.0, %v1147_v12  ;;  %v1535_v62 = vmul.f32 %v2246_v17, %v1534_v9 }
 0x474   :  { %v1245_v53 = vmul.f32 %v1213_v50, %v3336_v11  ;;  %v1536_v42 = vmul.f32 0.5, %v1535_v62 }
 0x476   :  { %v3676_v63 = vsub.f32 %v1245_v53, %v3396_v34  ;;  %v1537_v10 = vsub.f32 1.5, %v1536_v42 }
 0x477   :  { %1865 = vrot.lane.b32.xlu1 %v3426_v45, %s2287_s10 }
 0x478   :  { %v1309_v43 = vmul.f32 %v3676_v63, %v3676_v63  ;;  %v1538_v13 = vmul.f32 %v2246_v17, %v1537_v10 }
 0x479   :  { %v1192_v56 = vpop.xlane.xlu1 %1191 }
 0x47a   :  { %v1228_v15 = vmul.f32 2.0, %v1192_v56  ;;  %v1369_v1 = vsel %vm622_vm2, %v1309_v43, 0.0  ;;  %v1542_v11 = vsel %vm1541_vm12, %v2246_v17, %v1538_v13  ;;  %v3885_v17 = vld [vmem:[#allocation13_spill] sm:$0xff]  ;;  %v3886_v56 = vld [vmem:[#allocation15_spill] sm:$0xff] }
 0x47b   :  { %1370 = vadd.xlane.f32.xlu0 %v1369_v1  ;;  %v1754_v34 = vmul.f32 %v1542_v11, %v3384_v24 }
 0x47c   :  { %v1260_v26 = vmul.f32 %v1228_v15, %v3426_v45 }
 0x47d   :  { %v1914_v60 = vsel %vm622_vm2, %v1754_v34, %v3883_v33 }
 0x47e   :  { %v3688_v36 = vsub.f32 %v1260_v26, %v3434_v28  ;;  %v1947_v59 = vsel %vm1935_vm9, %v1914_v60, 0.0 }
 0x47f   :  { %1980 = vst.msk [vmem:[%s3816_s6 + $0x58] sm:$0xff] %vm1968_vm10, %v1947_v59 }
 0x480   :  { %v1324_v19 = vmul.f32 %v3688_v36, %v3688_v36 }
 0x481   :  { %v1329_v0 = vpop.xlane.xlu1 %1328 }
 0x482   :  { %2247 = vrsqrt.f32 %v1329_v0  ;;  %v1414_v24 = vsel %vm622_vm2, %v1324_v19, 0.0  ;;  %vm1429_vm14 = vweird.f32 %v1329_v0 }
 0x483   :  { %1415 = vadd.xlane.f32.xlu0 %v1414_v24 }
 0x488   :  { %v2248_v45 = vpop.eup %2247 }
 0x489   :  { %v1424_v41 = vmul.f32 %v2248_v45, %v1329_v0  ;;  %v1338_v44 = vpop.xlane.xlu1 %1337  ;;  %vm1430_vm13 = vweird.f32 %v2248_v45 }
 0x48a   :  { %2249 = vrsqrt.f32 %v1338_v44  ;;  %vm1431_vm15 = vmor %vm1429_vm14, %vm1430_vm13  ;;  %vm1459_vm1 = vweird.f32 %v1338_v44 }
 0x48b   :  { %v1425_v28 = vmul.f32 %v2248_v45, %v1424_v41 }
 0x48d   :  { %v1426_v32 = vmul.f32 0.5, %v1425_v28 }
 0x48f   :  { %v1427_v58 = vsub.f32 1.5, %v1426_v32 }
 0x490   :  { %v2250_v20 = vpop.eup %2249 }
 0x491   :  { %v1428_v48 = vmul.f32 %v2248_v45, %v1427_v58  ;;  %v1454_v30 = vmul.f32 %v2250_v20, %v1338_v44  ;;  %v1383_v21 = vpop.xlane.xlu1 %1382  ;;  %vm1460_vm0 = vweird.f32 %v2250_v20 }
 0x492   :  { %2251 = vrsqrt.f32 %v1383_v21  ;;  %vm1461_vm3 = vmor %vm1459_vm1, %vm1460_vm0  ;;  %vm1609_vm5 = vweird.f32 %v1383_v21 }
 0x493   :  { %v1432_v38 = vsel %vm1431_vm15, %v2248_v45, %v1428_v48  ;;  %v1455_v22 = vmul.f32 %v2250_v20, %v1454_v30  ;;  %v3887_v45 = vld [vmem:[#allocation21_spill] sm:$0xff] }
 0x494   :  { %v1743_v7 = vmul.f32 %v1432_v38, %v3466_v23 }
 0x495   :  { %v1456_v61 = vmul.f32 0.5, %v1455_v22 }
 0x496   :  { %v1903_v2 = vsel %vm622_vm2, %v1743_v7, %v3884_v16 }
 0x497   :  { %v1936_v57 = vsel %vm1935_vm9, %v1903_v2, 0.0  ;;  %v1457_v46 = vsub.f32 1.5, %v1456_v61  ;;  %1867 = vrot.lane.b32.xlu0 %v3879_v4, %s2287_s10  ;;  %v3888_v61 = vld [vmem:[#allocation22_spill] sm:$0xff] }
 0x498   :  { %v2252_v25 = vpop.eup %2251  ;;  %1969 = vst.msk [vmem:[%s3816_s6] sm:$0xff] %vm1968_vm10, %v1936_v57 }
 0x499   :  { %v1458_v18 = vmul.f32 %v2250_v20, %v1457_v46  ;;  %v1604_v23 = vmul.f32 %v2252_v25, %v1383_v21  ;;  %v1347_v29 = vpop.xlane.xlu1 %1346  ;;  %vm1610_vm4 = vweird.f32 %v2252_v25 }
 0x49a   :  { %2253 = vrsqrt.f32 %v1347_v29  ;;  %vm1611_vm6 = vmor %vm1609_vm5, %vm1610_vm4  ;;  %vm1489_vm8 = vweird.f32 %v1347_v29 }
 0x49b   :  { %v1462_v14 = vsel %vm1461_vm3, %v2250_v20, %v1458_v18  ;;  %v1605_v31 = vmul.f32 %v2252_v25, %v1604_v23 }
 0x49c   :  { %v1746_v37 = vmul.f32 %v1462_v14, %v3492_v27 }
 0x49d   :  { %v1606_v8 = vmul.f32 0.5, %v1605_v31 }
 0x49e   :  { %v1906_v4 = vsel %vm622_vm2, %v1746_v37, %v3885_v17 }
 0x49f   :  { %v1939_v9 = vsel %vm1935_vm9, %v1906_v4, 0.0  ;;  %v1607_v12 = vsub.f32 1.5, %v1606_v8 }
 0x4a0   :  { %v2254_v50 = vpop.eup %2253  ;;  %1972 = vst.msk [vmem:[%s3816_s6 + $0x18] sm:$0xff] %vm1968_vm10, %v1939_v9  ;;  %v3889_v9 = vld [vmem:[#allocation23_spill] sm:$0xff] }
 0x4a1   :  { %v1608_v62 = vmul.f32 %v2252_v25, %v1607_v12  ;;  %v1484_v53 = vmul.f32 %v2254_v50, %v1347_v29  ;;  %v1392_v42 = vpop.xlane.xlu1 %1391  ;;  %vm1490_vm7 = vweird.f32 %v2254_v50 }
 0x4a2   :  { %2255 = vrsqrt.f32 %v1392_v42  ;;  %vm1491_vm11 = vmor %vm1489_vm8, %vm1490_vm7  ;;  %vm1639_vm13 = vweird.f32 %v1392_v42 }
 0x4a3   :  { %v1612_v27 = vsel %vm1611_vm6, %v2252_v25, %v1608_v62  ;;  %v1485_v10 = vmul.f32 %v2254_v50, %v1484_v53 }
 0x4a4   :  { %v1761_v43 = vmul.f32 %v1612_v27, %v3510_v52 }
 0x4a5   :  { %v1486_v13 = vmul.f32 0.5, %v1485_v10 }
 0x4a6   :  { %v1921_v15 = vsel %vm622_vm2, %v1761_v43, %v3886_v56 }
 0x4a7   :  { %v1954_v1 = vsel %vm1935_vm9, %v1921_v15, 0.0  ;;  %v1487_v11 = vsub.f32 1.5, %v1486_v13 }
 0x4a8   :  { %v2256_v34 = vpop.eup %2255  ;;  %1987 = vst.msk [vmem:[%s3816_s6 + $0x90] sm:$0xff] %vm1968_vm10, %v1954_v1 }
 0x4a9   :  { %v1488_v26 = vmul.f32 %v2254_v50, %v1487_v11  ;;  %v1634_v33 = vmul.f32 %v2256_v34, %v1392_v42  ;;  %v1356_v60 = vpop.xlane.xlu1 %1355  ;;  %vm1640_vm12 = vweird.f32 %v2256_v34 }
 0x4aa   :  { %2257 = vrsqrt.f32 %v1356_v60  ;;  %vm1641_vm14 = vmor %vm1639_vm13, %vm1640_vm12  ;;  %vm1519_vm0 = vweird.f32 %v1356_v60 }
 0x4ab   :  { %v1492_v52 = vsel %vm1491_vm11, %v2254_v50, %v1488_v26  ;;  %v1635_v59 = vmul.f32 %v2256_v34, %v1634_v33  ;;  %v1407_v0 = vpop.xlane.xlu0 %1406 }
 0x4ac   :  { %v1749_v19 = vmul.f32 %v1492_v52, %v3530_v5  ;;  %2259 = vrsqrt.f32 %v1407_v0  ;;  %vm1689_vm4 = vweird.f32 %v1407_v0 }
 0x4ad   :  { %v1636_v24 = vmul.f32 0.5, %v1635_v59 }
 0x4ae   :  { %v1909_v41 = vsel %vm622_vm2, %v1749_v19, %v3887_v45 }
 0x4af   :  { %v1942_v44 = vsel %vm1935_vm9, %v1909_v41, 0.0  ;;  %v1637_v28 = vsub.f32 1.5, %v1636_v24  ;;  %v3891_v41 = vld [vmem:[#allocation25_spill] sm:$0xff] }
 0x4b0   :  { %v2258_v32 = vpop.eup %2257  ;;  %1975 = vst.msk [vmem:[%s3816_s6 + $0x30] sm:$0xff] %vm1968_vm10, %v1942_v44 }
 0x4b1   :  { %v1638_v58 = vmul.f32 %v2256_v34, %v1637_v28  ;;  %v1514_v20 = vmul.f32 %v2258_v32, %v1356_v60  ;;  %v1401_v5 = vpop.xlane.xlu1 %1400  ;;  %vm1520_vm15 = vweird.f32 %v2258_v32 }
 0x4b2   :  { %2261 = vrsqrt.f32 %v1401_v5  ;;  %v2260_v48 = vpop.eup %2259  ;;  %vm1521_vm1 = vmor %vm1519_vm0, %vm1520_vm15  ;;  %vm1669_vm7 = vweird.f32 %v1401_v5 }
 0x4b3   :  { %v1642_v30 = vsel %vm1641_vm14, %v2256_v34, %v1638_v58  ;;  %v1515_v21 = vmul.f32 %v2258_v32, %v1514_v20  ;;  %v1684_v22 = vmul.f32 %v2260_v48, %v1407_v0  ;;  %vm1690_vm3 = vweird.f32 %v2260_v48  ;;  %v3890_v34 = vld [vmem:[#allocation24_spill] sm:$0xff] }
 0x4b4   :  { %v1764_v38 = vmul.f32 %v1642_v30, %v3546_v49  ;;  %vm1691_vm5 = vmor %vm1689_vm4, %vm1690_vm3 }
 0x4b5   :  { %v1516_v7 = vmul.f32 0.5, %v1515_v21  ;;  %v1685_v2 = vmul.f32 %v2260_v48, %v1684_v22 }
 0x4b6   :  { %v1924_v16 = vsel %vm622_vm2, %v1764_v38, %v3888_v61  ;;  %v3892_v38 = vld [vmem:[#allocation26_spill] sm:$0xff] }
 0x4b7   :  { %v1957_v57 = vsel %vm1935_vm9, %v1924_v16, 0.0  ;;  %v1517_v46 = vsub.f32 1.5, %v1516_v7  ;;  %v1686_v18 = vmul.f32 0.5, %v1685_v2 }
 0x4b8   :  { %v2262_v25 = vpop.eup %2261  ;;  %1990 = vst.msk [vmem:[%s3816_s6 + $0xa8] sm:$0xff] %vm1968_vm10, %v1957_v57 }
 0x4b9   :  { %v1518_v23 = vmul.f32 %v2258_v32, %v1517_v46  ;;  %v1664_v49 = vmul.f32 %v2262_v25, %v1401_v5  ;;  %v1365_v29 = vpop.xlane.xlu1 %1364  ;;  %v1687_v14 = vsub.f32 1.5, %v1686_v18  ;;  %vm1670_vm6 = vweird.f32 %v2262_v25 }
 0x4ba   :  { %2263 = vrsqrt.f32 %v1365_v29  ;;  %vm1671_vm8 = vmor %vm1669_vm7, %vm1670_vm6  ;;  %vm1549_vm12 = vweird.f32 %v1365_v29 }
 0x4bb   :  { %v1522_v31 = vsel %vm1521_vm1, %v2258_v32, %v1518_v23  ;;  %v1665_v37 = vmul.f32 %v2262_v25, %v1664_v49  ;;  %v1688_v17 = vmul.f32 %v2260_v48, %v1687_v14 }
 0x4bc   :  { %v1752_v8 = vmul.f32 %v1522_v31, %v3564_v40 }
 0x4bd   :  { %v1666_v4 = vmul.f32 0.5, %v1665_v37  ;;  %v1692_v50 = vsel %vm1691_vm5, %v2260_v48, %v1688_v17 }
 0x4be   :  { %v1912_v12 = vsel %vm622_vm2, %v1752_v8, %v3889_v9  ;;  %v1769_v53 = vmul.f32 %v1692_v50, %v3589_v51 }
 0x4bf   :  { %v1945_v62 = vsel %vm1935_vm9, %v1912_v12, 0.0  ;;  %v1667_v42 = vsub.f32 1.5, %v1666_v4 }
 0x4c0   :  { %v2264_v27 = vpop.eup %2263  ;;  %1978 = vst.msk [vmem:[%s3816_s6 + $0x48] sm:$0xff] %vm1968_vm10, %v1945_v62  ;;  %v1929_v40 = vsel %vm622_vm2, %v1769_v53, %v3551_v35 }
 0x4c1   :  { %v1668_v10 = vmul.f32 %v2262_v25, %v1667_v42  ;;  %v1544_v43 = vmul.f32 %v2264_v27, %v1365_v29  ;;  %v1410_v13 = vpop.xlane.xlu1 %1409  ;;  %v1962_v56 = vsel %vm1935_vm9, %v1929_v40, 0.0  ;;  %vm1550_vm11 = vweird.f32 %v2264_v27 }
 0x4c2   :  { %2265 = vrsqrt.f32 %v1410_v13  ;;  %1995 = vst.msk [vmem:[%s3816_s6 + $0xd0] sm:$0xff] %vm1968_vm10, %v1962_v56  ;;  %vm1551_vm13 = vmor %vm1549_vm12, %vm1550_vm11  ;;  %vm1699_vm15 = vweird.f32 %v1410_v13 }
 0x4c3   :  { %v1672_v51 = vsel %vm1671_vm8, %v2262_v25, %v1668_v10  ;;  %v1545_v15 = vmul.f32 %v2264_v27, %v1544_v43 }
 0x4c4   :  { %v1767_v1 = vmul.f32 %v1672_v51, %v3583_v6 }
 0x4c5   :  { %v1546_v11 = vmul.f32 0.5, %v1545_v15 }
 0x4c6   :  { %v1927_v35 = vsel %vm622_vm2, %v1767_v1, %v3890_v34 }
 0x4c7   :  { %v1960_v26 = vsel %vm1935_vm9, %v1927_v35, 0.0  ;;  %v1547_v33 = vsub.f32 1.5, %v1546_v11 }
 0x4c8   :  { %v2266_v60 = vpop.eup %2265  ;;  %1993 = vst.msk [vmem:[%s3816_s6 + $0xc0] sm:$0xff] %vm1968_vm10, %v1960_v26 }
 0x4c9   :  { %v1548_v52 = vmul.f32 %v2264_v27, %v1547_v33  ;;  %v1694_v59 = vmul.f32 %v2266_v60, %v1410_v13  ;;  %v1374_v19 = vpop.xlane.xlu1 %1373  ;;  %vm1700_vm14 = vweird.f32 %v2266_v60 }
 0x4ca   :  { %2267 = vrsqrt.f32 %v1374_v19  ;;  %vm1701_vm0 = vmor %vm1699_vm15, %vm1700_vm14  ;;  %vm1579_vm3 = vweird.f32 %v1374_v19 }
 0x4cb   :  { %v1552_v6 = vsel %vm1551_vm13, %v2264_v27, %v1548_v52  ;;  %v1695_v0 = vmul.f32 %v2266_v60, %v1694_v59 }
 0x4cc   :  { %v1755_v24 = vmul.f32 %v1552_v6, %v3619_v3 }
 0x4cd   :  { %v1696_v45 = vmul.f32 0.5, %v1695_v0 }
 0x4ce   :  { %v1915_v44 = vsel %vm622_vm2, %v1755_v24, %v3891_v41 }
 0x4cf   :  { %v1948_v28 = vsel %vm1935_vm9, %v1915_v44, 0.0  ;;  %v1697_v32 = vsub.f32 1.5, %v1696_v45 }
 0x4d0   :  { %v2268_v58 = vpop.eup %2267  ;;  %1981 = vst.msk [vmem:[%s3816_s6 + $0x60] sm:$0xff] %vm1968_vm10, %v1948_v28 }
 0x4d1   :  { %v1698_v20 = vmul.f32 %v2266_v60, %v1697_v32  ;;  %v1574_v5 = vmul.f32 %v2268_v58, %v1374_v19  ;;  %vm1580_vm1 = vweird.f32 %v2268_v58  ;;  %v1419_v18 = vpop.xlane.xlu1 %1418 }
 0x4d2   :  { %vm1581_vm4 = vmor %vm1579_vm3, %vm1580_vm1  ;;  %2269 = vrsqrt.f32 %v1419_v18  ;;  %vm1729_vm11 = vweird.f32 %v1419_v18 }
 0x4d3   :  { %v1702_v48 = vsel %vm1701_vm0, %v2266_v60, %v1698_v20  ;;  %v1575_v3 = vmul.f32 %v2268_v58, %v1574_v5 }
 0x4d4   :  { %v1770_v30 = vmul.f32 %v1702_v48, %v3633_v54  ;;  %v3893_v54 = vld [vmem:[#allocation27_spill] sm:$0xff] }
 0x4d5   :  { %v1576_v21 = vmul.f32 0.5, %v1575_v3 }
 0x4d6   :  { %v1930_v22 = vsel %vm622_vm2, %v1770_v30, %v3892_v38 }
 0x4d7   :  { %v1963_v7 = vsel %vm1935_vm9, %v1930_v22, 0.0  ;;  %v1577_v61 = vsub.f32 1.5, %v1576_v21 }
 0x4d8   :  { %1996 = vst.msk [vmem:[%s3816_s6 + $0xd8] sm:$0xff] %vm1968_vm10, %v1963_v7  ;;  %v2270_v23 = vpop.eup %2269 }
 0x4d9   :  { %v1578_v16 = vmul.f32 %v2268_v58, %v1577_v61  ;;  %v1724_v29 = vmul.f32 %v2270_v23, %v1419_v18  ;;  %vm1730_vm8 = vweird.f32 %v2270_v23 }
 0x4da   :  { %vm1731_vm12 = vmor %vm1729_vm11, %vm1730_vm8 }
 0x4db   :  { %v1582_v2 = vsel %vm1581_vm4, %v2268_v58, %v1578_v16  ;;  %v1725_v31 = vmul.f32 %v2270_v23, %v1724_v29 }
 0x4dc   :  { %v1758_v57 = vmul.f32 %v1582_v2, %v3641_v39 }
 0x4dd   :  { %v1726_v17 = vmul.f32 0.5, %v1725_v31 }
 0x4de   :  { %v1918_v46 = vsel %vm622_vm2, %v1758_v57, %v3893_v54 }
 0x4df   :  { %v1951_v25 = vsel %vm1935_vm9, %v1918_v46, 0.0  ;;  %v1727_v50 = vsub.f32 1.5, %v1726_v17 }
 0x4e0   :  { %1984 = vst.msk [vmem:[%s3816_s6 + $0x78] sm:$0xff] %vm1968_vm10, %v1951_v25 }
 0x4e1   :  { %v1728_v40 = vmul.f32 %v2270_v23, %v1727_v50 }
 0x4e3   :  { %v1732_v15 = vsel %vm1731_vm12, %v2270_v23, %v1728_v40 }
 0x4e4   :  { %v1773_v11 = vmul.f32 %v1732_v15, %v3656_v55 }
 0x4e9   :  { %v1866_v35 = vpop.permute.xlu1 %1865 }
 0x4ee   :  { %v1371_v49 = vpop.xlane.xlu0 %1370 }
 0x4ef   :  { %2271 = vrsqrt.f32 %v1371_v49  ;;  %vm1569_vm6 = vweird.f32 %v1371_v49 }
 0x4f5   :  { %v2272_v14 = vpop.eup %2271 }
 0x4f6   :  { %v1564_v37 = vmul.f32 %v2272_v14, %v1371_v49  ;;  %v1416_v39 = vpop.xlane.xlu0 %1415  ;;  %vm1570_vm5 = vweird.f32 %v2272_v14 }
 0x4f7   :  { %2273 = vrsqrt.f32 %v1416_v39  ;;  %vm1571_vm7 = vmor %vm1569_vm6, %vm1570_vm5  ;;  %vm1719_vm14 = vweird.f32 %v1416_v39 }
 0x4f8   :  { %v1565_v8 = vmul.f32 %v2272_v14, %v1564_v37 }
 0x4fa   :  { %v1566_v4 = vmul.f32 0.5, %v1565_v8 }
 0x4fc   :  { %v1567_v9 = vsub.f32 1.5, %v1566_v4 }
 0x4fd   :  { %v2274_v12 = vpop.eup %2273 }
 0x4fe   :  { %v1568_v62 = vmul.f32 %v2272_v14, %v1567_v9  ;;  %v1714_v53 = vmul.f32 %v2274_v12, %v1416_v39  ;;  %vm1720_vm13 = vweird.f32 %v2274_v12 }
 0x4ff   :  { %vm1721_vm15 = vmor %vm1719_vm14, %vm1720_vm13 }
 0x500   :  { %v1572_v42 = vsel %vm1571_vm7, %v2272_v14, %v1568_v62  ;;  %v1715_v27 = vmul.f32 %v2274_v12, %v1714_v53 }
 0x501   :  { %v1757_v10 = vmul.f32 %v1572_v42, %v3676_v63 }
 0x502   :  { %v1716_v43 = vmul.f32 0.5, %v1715_v27 }
 0x503   :  { %v1917_v13 = vsel %vm622_vm2, %v1757_v10, %v3672_v47 }
 0x504   :  { %v1950_v56 = vsel %vm1935_vm9, %v1917_v13, 0.0  ;;  %v1717_v51 = vsub.f32 1.5, %v1716_v43 }
 0x505   :  { %1983 = vst.msk [vmem:[%s3816_s6 + $0x70] sm:$0xff] %vm1968_vm10, %v1950_v56 }
 0x506   :  { %v1718_v1 = vmul.f32 %v2274_v12, %v1717_v51 }
 0x508   :  { %v1722_v63 = vsel %vm1721_vm15, %v2274_v12, %v1718_v1 }
 0x509   :  { %v1772_v34 = vmul.f32 %v1722_v63, %v3688_v36  ;;  %v1868_v47 = vpop.permute.xlu0 %1867 }
 0x50a   :  { %v1933_v26 = vsel %vm622_vm2, %v1773_v11, %v1868_v47 }
 0x50b   :  { %v1932_v33 = vsel %vm622_vm2, %v1772_v34, %v1866_v35  ;;  %v1966_v60 = vsel %vm1935_vm9, %v1933_v26, 0.0 }
 0x50c   :  { %v1965_v52 = vsel %vm1935_vm9, %v1932_v33, 0.0  ;;  %1999 = vst.msk [vmem:[%s3816_s6 + $0xf0] sm:$0xff] %vm1968_vm10, %v1966_v60 }
 0x50d   :  { %1998 = vst.msk [vmem:[%s3816_s6 + $0xe8] sm:$0xff] %vm1968_vm10, %v1965_v52 }

</bundles_post_ra>
